<compile_context>
chip_gen: v5e
topology: v5e:2x2
jax: 0.10.0
libtpu: 0.0.40
codegen_flags: <defaults>
</compile_context>

<pallas_src>
import functools

import jax
import jax.numpy as jnp
import numpy as np
from jax.experimental import pallas as pl
from jax.experimental.pallas import tpu as pltpu

SELU_ALPHA = 1.6732632423543772848170429916717
SELU_SCALE = 1.0507009873554804934193349852946


# --------------------------------------------------------------------------------------
# Kernel
# --------------------------------------------------------------------------------------
def _gat_kernel(xi_ref, x_ref, w_att_ref, w12_ref, vecs_ref, o_ref, *, use_bf16):
    """One grid step: `bb` batch elements x `ti` query rows of the GraphAttentionLayer forward."""
    bb, ti, din = xi_ref.shape
    n = x_ref.shape[1]
    dout = o_ref.shape[2]
    cdt = jnp.bfloat16 if use_bf16 else jnp.float32

    x_all = x_ref[...]                                   # (bb, n, din)  all nodes (j axis), f32
    x_i = xi_ref[...]                                     # (bb, ti, din) this tile's query rows
    vecs = vecs_ref[...]                                   # (3, dout)
    b_att, att_w, bias = vecs[0:1], vecs[1:2], vecs[2:3]   # (1, dout) each; 1/temp folded in att_w

    # ---- projection path (independent of the softmax chain).  Issued here so the scheduler can
    #      hide the MXU work under the EUP-heavy tanh/exp chain below (no [att@x | x] concat).
    if ti == n:
        # single i-tile: one fused (din)x(2*dout) matmul, static lane split of the result
        xw12 = jnp.dot(x_all.reshape(bb * n, din), w12_ref[...],
                       preferred_element_type=jnp.float32).reshape(bb, n, 2 * dout)
        xw1, xw2_i = xw12[..., :dout], xw12[..., dout:]
    else:
        # i-tiled: xw1 needed for all j rows, xw2 only for this tile's query rows
        xw1 = jnp.dot(x_all.reshape(bb * n, din), w12_ref[:, :dout],
                      preferred_element_type=jnp.float32).reshape(bb, n, dout)
        xw2_i = jnp.dot(x_i.reshape(bb * ti, din), w12_ref[:, dout:],
                        preferred_element_type=jnp.float32).reshape(bb, ti, dout)

    # ---- _pairwise_mul_nodes + att_proj + tanh  (the N^2-scaled part; bf16 on v6e/v7x)
    p = x_i.astype(cdt)[:, :, None, :] * x_all.astype(cdt)[:, None, :, :]   # (bb, ti, n, din)
    h = jnp.dot(p.reshape(bb * ti * n, din), w_att_ref[...].astype(cdt),
                preferred_element_type=jnp.float32)                          # f32 accumulate
    h = jnp.tanh(h + b_att)                                                   # (bb*ti*n, dout)

    # ---- attention scores (temperature folded into att_w) + softmax over j (torch dim=-2)
    scores = jnp.sum(h.reshape(bb, ti, n, dout) * att_w, axis=-1)             # (bb, ti, n)
    m = jnp.max(scores, axis=-1, keepdims=True)
    e = jnp.exp(scores - m)
    s = jnp.sum(e, axis=-1, keepdims=True)
    r = pl.reciprocal(s, approx=True)          # EUP vrcp (avoids the precise-divide path) ...
    r = r * (2.0 - s * r)                      # ... + one Newton step: f32-accurate, VPU-only
    att = e * r                                # (bb, ti, n)

    # ---- attention-weighted aggregation of the projected nodes:  att @ (x @ W1s)
    if n <= 32:
        # tiny per-batch matmuls (<5% MXU util) -> VPU broadcast-multiply + sublane (XLU) reduce
        ax1 = jnp.sum(att[:, :, :, None] * xw1[:, None, :, :], axis=2)        # (bb, ti, dout)
    else:
        ax1 = jnp.einsum("bij,bjd->bid", att, xw1,
                         preferred_element_type=jnp.float32)

    # ---- fused bias (b1 + b2 + BN folded) + SELU
    y = ax1 + xw2_i + bias
    y = SELU_SCALE * jnp.where(y > 0.0, y, SELU_ALPHA * (jnp.exp(y) - 1.0))
    o_ref[...] = y.astype(o_ref.dtype)


# --------------------------------------------------------------------------------------
# Generation-aware sizing helpers
# --------------------------------------------------------------------------------------
def _chip_traits():
    """(use_bf16, two_tensorcores, intermediates_budget_bytes, vmem_limit_cap_bytes)."""
    kind = ""
    try:
        kind = jax.devices()[0].device_kind.lower()
    except Exception:
        pass
    try:
        vmem_cap = int(pltpu.get_tpu_info().vmem_capacity_bytes)
    except Exception:
        vmem_cap = 64 * 2**20                      # conservative fallback (v7x-sized)
    is_v7 = ("v7" in kind) or ("7x" in kind)
    use_bf16 = is_v7 or ("v6" in kind)             # v5e and older: no native bf16 VPU/EUP
    two_cores = is_v7
    if vmem_cap >= 96 * 2**20:                     # v5e / v6e: 128 MiB physical VMEM
        return use_bf16, two_cores, 64 * 2**20, 100 * 2**20
    return use_bf16, two_cores, 36 * 2**20, 40 * 2**20   # v7x: 64 MiB physical


def _per_batch_block_bytes(N, ti, Din, Dout, use_bf16):
    """Rough per-batch-element VMEM bytes of one grid step's intermediates (post-reassociation)."""
    f32 = 4
    pb = 2 if use_bf16 else 4
    pair = ti * N * (Din * pb + 3 * Dout * f32 + 4 * f32)        # pair tensor, acc/tanh, scores
    node = (N * (Din * (f32 + pb) + 2 * Dout * f32)
            + ti * (Din * (f32 + pb) + 4 * Dout * f32))          # x copies, xw1/xw2, y
    agg = ti * N * Dout * f32                                    # att*xw1 broadcast product
    return pair + node + agg


def _choose_tile_i(N, Din, Dout, budget_bytes, use_bf16):
    """i-row tile: full N when small, otherwise a multiple-of-8 divisor bounding the N^2 tensor."""
    if N <= 128:
        return N
    for ti in range(128, 7, -8):
        if N % ti == 0 and _per_batch_block_bytes(N, ti, Din, Dout, use_bf16) <= budget_bytes:
            return ti
    return N   # TODO(synk): pad/mask the i axis when N has no multiple-of-8 divisor <= 128.


def _choose_block_batch(B, N, ti, Din, Dout, budget_bytes, use_bf16, two_cores):
    """Largest BB dividing B whose per-step intermediates fit the generation-aware budget.

    On single-TensorCore chips (v5e/v6e) the grid is a serial loop, so BB may grow to the whole
    batch.  On v7x (2 TCs) keep >= 2 grid steps, preferring an even step count for load balance.
    """
    n_i = -(-N // ti)
    per_b = _per_batch_block_bytes(N, ti, Din, Dout, use_bf16)
    cap = max(1, budget_bytes // max(per_b, 1))
    best, best_even = 1, None
    for bb in range(1, B + 1):
        if B % bb != 0 or bb > cap:
            continue
        steps = (B // bb) * n_i
        if two_cores and steps < 2:
            continue
        best = bb
        if steps % 2 == 0:
            best_even = bb
    if two_cores and best_even is not None:
        return best_even
    return best


def _vmem_limit_bytes(bb, N, ti, Din, Dout, use_bf16, limit_cap):
    f32 = 4
    io = 2 * bb * (ti * Din + N * Din + ti * Dout) * f32               # double-buffered blocks
    weights = 2 * (Din * Dout + 2 * Din * Dout + 3 * Dout) * f32
    est = io + weights + 4 * bb * _per_batch_block_bytes(N, ti, Din, Dout, use_bf16) + (4 << 20)
    return int(min(limit_cap, max(8 << 20, est)))


# --------------------------------------------------------------------------------------
# Wrapper
# --------------------------------------------------------------------------------------
def graph_attention_layer(x, folded, *, block_batch=None, tile_i=None, use_bf16=None):
    """x: (B, N, Din) float32, folded params from fold_params() -> (B, N, Dout) float32."""
    B, N, Din = x.shape
    Dout = folded["w_att"].shape[1]

    auto_bf16, two_cores, budget, limit_cap = _chip_traits()
    if use_bf16 is None:
        use_bf16 = auto_bf16

    ti = _choose_tile_i(N, Din, Dout, budget, use_bf16) if tile_i is None else tile_i
    assert N % ti == 0 and (ti == N or ti % 8 == 0), (N, ti)
    n_i = N // ti

    bb = (_choose_block_batch(B, N, ti, Din, Dout, budget, use_bf16, two_cores)
          if block_batch is None else block_batch)
    assert B % bb == 0, (B, bb)
    grid = (B // bb, n_i)   # batch outer, i-tiles inner (x_all block constant across inner axis)

    def fixed(arr):   # whole-array weight block, constant index map (not re-fetched per step)
        nd = arr.ndim
        return pl.BlockSpec(arr.shape, lambda b, it: (0,) * nd)

    kernel = functools.partial(_gat_kernel, use_bf16=use_bf16)

    return pl.pallas_call(
        kernel,
        out_shape=jax.ShapeDtypeStruct((B, N, Dout), jnp.float32),
        grid_spec=pltpu.PrefetchScalarGridSpec(
            num_scalar_prefetch=0,
            grid=grid,
            in_specs=[
                pl.BlockSpec((bb, ti, Din), lambda b, it: (b, it, 0)),   # query rows of this tile
                pl.BlockSpec((bb, N, Din), lambda b, it: (b, 0, 0)),     # all nodes (j axis)
                fixed(folded["w_att"]),   # (Din, Dout)     att_proj weight
                fixed(folded["w12"]),     # (Din, 2*Dout)   [W1*bn_s | W2*bn_s]
                fixed(folded["vecs"]),    # (3, Dout)       [b_att ; att_w/temp ; fused bias]
            ],
            out_specs=pl.BlockSpec((bb, ti, Dout), lambda b, it: (b, it, 0)),
        ),
        compiler_params=pltpu.CompilerParams(
            dimension_semantics=("parallel", "parallel"),
            vmem_limit_bytes=_vmem_limit_bytes(bb, N, ti, Din, Dout, use_bf16, limit_cap)),
    )(x, x, folded["w_att"], folded["w12"], folded["vecs"])


# --------------------------------------------------------------------------------------
# Parameter folding, pure-JAX reference, init
# --------------------------------------------------------------------------------------
def fold_params(raw, temp=1.0, eps=1e-5):
    """Fold temperature, eval-mode BatchNorm and both linear biases into the weights (done once)."""
    bn_scale = raw["gamma"] / jnp.sqrt(raw["run_var"] + eps)            # (Dout,)
    bn_bias = raw["beta"] - raw["run_mean"] * bn_scale                  # (Dout,)
    w1s = raw["w1"] * bn_scale[None, :]
    w2s = raw["w2"] * bn_scale[None, :]
    bias = (raw["b1"] + raw["b2"]) * bn_scale + bn_bias                 # (Dout,)
    vecs = jnp.stack([raw["b_att"], raw["att_w"][:, 0] / temp, bias], axis=0)   # (3, Dout)
    return {
        "w_att": raw["w_att"],                                          # (Din, Dout)
        "w12": jnp.concatenate([w1s, w2s], axis=1),                     # (Din, 2*Dout)
        "vecs": vecs,                                                   # (3, Dout)
    }


def reference(x, raw, temp=1.0, eps=1e-5):
    """Pure-JAX mirror of the PyTorch forward (eval mode), using the UNfolded params."""
    p = x[:, :, None, :] * x[:, None, :, :]                  # (B, N, N, Din)
    h = jnp.tanh(p @ raw["w_att"] + raw["b_att"])            # (B, N, N, Dout)
    scores = (h @ raw["att_w"])[..., 0] / temp               # (B, N, N)
    att = jax.nn.softmax(scores, axis=-1)                    # torch softmax(dim=-2) of (B,N,N,1)
    ax = jnp.einsum("bij,bjd->bid", att, x)
    y = (ax @ raw["w1"] + raw["b1"]) + (x @ raw["w2"] + raw["b2"])
    y = (y - raw["run_mean"]) / jnp.sqrt(raw["run_var"] + eps) * raw["gamma"] + raw["beta"]
    return SELU_SCALE * jnp.where(y > 0, y, SELU_ALPHA * (jnp.exp(y) - 1.0))


def init_params(key, in_dim, out_dim):
    ks = jax.random.split(key, 11)
    lin_w = lambda k: jax.random.normal(k, (in_dim, out_dim), jnp.float32) * 0.1   # stored (in, out)
    lin_b = lambda k: jax.random.normal(k, (out_dim,), jnp.float32) * 0.05
    att_std = float(np.sqrt(2.0 / (out_dim + 1)))            # xavier-normal for (out_dim, 1)
    return {
        "w_att": lin_w(ks[0]), "b_att": lin_b(ks[1]),
        "att_w": jax.random.normal(ks[2], (out_dim, 1), jnp.float32) * att_std,
        "w1": lin_w(ks[3]), "b1": lin_b(ks[4]),
        "w2": lin_w(ks[5]), "b2": lin_b(ks[6]),
        # non-trivial BatchNorm parameters/stats so the folding path is actually exercised
        "gamma": 1.0 + 0.1 * jax.random.normal(ks[7], (out_dim,), jnp.float32),
        "beta": 0.1 * jax.random.normal(ks[8], (out_dim,), jnp.float32),
        "run_mean": 0.1 * jax.random.normal(ks[9], (out_dim,), jnp.float32),
        "run_var": 1.0 + 0.1 * jnp.abs(jax.random.normal(ks[10], (out_dim,), jnp.float32)),
    }


if __name__ == "__main__":
    key = jax.random.PRNGKey(0)
    k_x, k_p, k_x2 = jax.random.split(key, 3)

    D_IN, D_OUT, TEMP = 32, 32, 2.0
    raw = init_params(k_p, D_IN, D_OUT)
    folded = fold_params(raw, temp=TEMP)

    # bf16 is auto-enabled on v6e/v7x (native bf16 VPU/EUP); relax the tolerance accordingly.
    bf16_active = _chip_traits()[0]
    tol = dict(rtol=3e-2, atol=3e-2) if bf16_active else dict(rtol=2e-4, atol=2e-4)

    # Case 1: module-like small dims (single i-tile path, fused W12 matmul).
    B, N = 4, 8
    x = jax.random.normal(k_x, (B, N, D_IN), jnp.float32)
    out = jax.block_until_ready(graph_attention_layer(x, folded))
    ref = jax.block_until_ready(reference(x, raw, temp=TEMP))
    np.testing.assert_allclose(np.asarray(out), np.asarray(ref), **tol)

    # Case 2: exercise the i-row tiling path (two i-tiles of 8 query rows each).
    B2, N2 = 2, 16
    x2 = jax.random.normal(k_x2, (B2, N2, D_IN), jnp.float32)
    out2 = jax.block_until_ready(graph_attention_layer(x2, folded, tile_i=8))
    ref2 = jax.block_until_ready(reference(x2, raw, temp=TEMP))
    np.testing.assert_allclose(np.asarray(out2), np.asarray(ref2), **tol)

    print("KERNEL_OK")
</pallas_src>

<mosaic_0001>
module attributes {stable_mosaic.version = 11 : i64} {
  func.func @_gat_kernel(%arg0: i32, %arg1: i32, %arg2: memref<4x8x32xf32, #tpu.memory_space<vmem>>, %arg3: memref<4x8x32xf32, #tpu.memory_space<vmem>>, %arg4: memref<32x32xf32, #tpu.memory_space<vmem>>, %arg5: memref<32x64xf32, #tpu.memory_space<vmem>>, %arg6: memref<3x32xf32, #tpu.memory_space<vmem>>, %arg7: memref<4x8x32xf32, #tpu.memory_space<vmem>>) attributes {dimension_semantics = [#tpu.dimension_semantics<parallel>, #tpu.dimension_semantics<parallel>], iteration_bounds = array<i64: 1, 1>, scalar_prefetch = 0 : i64, scratch_operands = 0 : i64, tpu.core_type = #tpu.core_type<tc>, window_params = [{transform_indices = @transform_0, window_bounds = array<i64: 4, 8, 32>}, {transform_indices = @transform_1, window_bounds = array<i64: 4, 8, 32>}, {pipeline_mode = #tpu.pipeline_mode<synchronous>, transform_indices = @transform_2, window_bounds = array<i64: 32, 32>}, {pipeline_mode = #tpu.pipeline_mode<synchronous>, transform_indices = @transform_3, window_bounds = array<i64: 32, 64>}, {pipeline_mode = #tpu.pipeline_mode<synchronous>, transform_indices = @transform_4, window_bounds = array<i64: 3, 32>}, {transform_indices = @transform_5, window_bounds = array<i64: 4, 8, 32>}]} {
    %c0 = arith.constant 0 : index
    %c0_0 = arith.constant 0 : index
    %c0_1 = arith.constant 0 : index
    %0 = vector.load %arg3[%c0, %c0_0, %c0_1] : memref<4x8x32xf32, #tpu.memory_space<vmem>>, vector<4x8x32xf32>
    %c0_2 = arith.constant 0 : index
    %c0_3 = arith.constant 0 : index
    %c0_4 = arith.constant 0 : index
    %1 = vector.load %arg2[%c0_2, %c0_3, %c0_4] : memref<4x8x32xf32, #tpu.memory_space<vmem>>, vector<4x8x32xf32>
    %c0_5 = arith.constant 0 : index
    %c0_6 = arith.constant 0 : index
    %2 = vector.load %arg6[%c0_5, %c0_6] : memref<3x32xf32, #tpu.memory_space<vmem>>, vector<3x32xf32>
    %3 = vector.extract_strided_slice %2 {offsets = [0, 0], sizes = [1, 32], strides = [1, 1]} : vector<3x32xf32> to vector<1x32xf32>
    %4 = vector.extract_strided_slice %2 {offsets = [1, 0], sizes = [1, 32], strides = [1, 1]} : vector<3x32xf32> to vector<1x32xf32>
    %5 = vector.extract_strided_slice %2 {offsets = [2, 0], sizes = [1, 32], strides = [1, 1]} : vector<3x32xf32> to vector<1x32xf32>
    %6 = vector.shape_cast %0 : vector<4x8x32xf32> to vector<32x32xf32>
    %c0_7 = arith.constant 0 : index
    %c0_8 = arith.constant 0 : index
    %7 = vector.load %arg5[%c0_7, %c0_8] : memref<32x64xf32, #tpu.memory_space<vmem>>, vector<32x64xf32>
    %cst = arith.constant dense<0.000000e+00> : vector<32x64xf32>
    %8 = tpu.matmul %6, %7, %cst {dimension_numbers = #tpu.dot_dimension_numbers<[1], [0], [0], [1], [0, 0, 1, 1], [], []>} : vector<32x32xf32>, vector<32x64xf32>, vector<32x64xf32> -> vector<32x64xf32>
    %9 = vector.shape_cast %8 : vector<32x64xf32> to vector<4x8x64xf32>
    %10 = vector.extract_strided_slice %9 {offsets = [0, 0, 0], sizes = [4, 8, 32], strides = [1, 1, 1]} : vector<4x8x64xf32> to vector<4x8x32xf32>
    %11 = vector.extract_strided_slice %9 {offsets = [0, 0, 32], sizes = [4, 8, 32], strides = [1, 1, 1]} : vector<4x8x64xf32> to vector<4x8x32xf32>
    %12 = vector.shape_cast %1 : vector<4x8x32xf32> to vector<4x8x1x32xf32>
    %13 = vector.shape_cast %0 : vector<4x8x32xf32> to vector<4x1x8x32xf32>
    %14 = vector.broadcast %12 : vector<4x8x1x32xf32> to vector<4x8x8x32xf32>
    %15 = vector.broadcast %13 : vector<4x1x8x32xf32> to vector<4x8x8x32xf32>
    %16 = arith.mulf %14, %15 : vector<4x8x8x32xf32>
    %17 = vector.shape_cast %16 : vector<4x8x8x32xf32> to vector<256x32xf32>
    %c0_9 = arith.constant 0 : index
    %c0_10 = arith.constant 0 : index
    %18 = vector.load %arg4[%c0_9, %c0_10] : memref<32x32xf32, #tpu.memory_space<vmem>>, vector<32x32xf32>
    %cst_11 = arith.constant dense<0.000000e+00> : vector<256x32xf32>
    %19 = tpu.matmul %17, %18, %cst_11 {dimension_numbers = #tpu.dot_dimension_numbers<[1], [0], [0], [1], [0, 0, 1, 1], [], []>} : vector<256x32xf32>, vector<32x32xf32>, vector<256x32xf32> -> vector<256x32xf32>
    %20 = vector.broadcast %3 : vector<1x32xf32> to vector<256x32xf32>
    %21 = arith.addf %19, %20 : vector<256x32xf32>
    %22 = math.tanh %21 : vector<256x32xf32>
    %23 = vector.shape_cast %22 : vector<256x32xf32> to vector<4x8x8x32xf32>
    %24 = vector.shape_cast %4 : vector<1x32xf32> to vector<1x1x1x32xf32>
    %25 = vector.broadcast %24 : vector<1x1x1x32xf32> to vector<4x8x8x32xf32>
    %26 = arith.mulf %23, %25 : vector<4x8x8x32xf32>
    %cst_12 = arith.constant dense<0.000000e+00> : vector<4x8x8xf32>
    %27 = vector.multi_reduction <add>, %26, %cst_12 [3] : vector<4x8x8x32xf32> to vector<4x8x8xf32>
    %cst_13 = arith.constant dense<0xFF800000> : vector<4x8xf32>
    %28 = vector.multi_reduction <maximumf>, %27, %cst_13 [2] : vector<4x8x8xf32> to vector<4x8xf32>
    %29 = vector.shape_cast %28 : vector<4x8xf32> to vector<4x8x1xf32>
    %30 = vector.broadcast %29 : vector<4x8x1xf32> to vector<4x8x8xf32>
    %31 = arith.subf %27, %30 : vector<4x8x8xf32>
    %32 = math.exp %31 : vector<4x8x8xf32>
    %cst_14 = arith.constant dense<0.000000e+00> : vector<4x8xf32>
    %33 = vector.multi_reduction <add>, %32, %cst_14 [2] : vector<4x8x8xf32> to vector<4x8xf32>
    %34 = vector.shape_cast %33 : vector<4x8xf32> to vector<4x8x1xf32>
    %35 = tpu.reciprocal %34 {approx = true} : vector<4x8x1xf32> -> vector<4x8x1xf32>
    %36 = arith.mulf %34, %35 : vector<4x8x1xf32>
    %cst_15 = arith.constant 2.000000e+00 : f32
    %37 = vector.broadcast %cst_15 : f32 to vector<4x8x1xf32>
    %38 = arith.subf %37, %36 : vector<4x8x1xf32>
    %39 = arith.mulf %35, %38 : vector<4x8x1xf32>
    %40 = vector.broadcast %39 : vector<4x8x1xf32> to vector<4x8x8xf32>
    %41 = arith.mulf %32, %40 : vector<4x8x8xf32>
    %42 = vector.shape_cast %41 : vector<4x8x8xf32> to vector<4x8x8x1xf32>
    %43 = vector.shape_cast %10 : vector<4x8x32xf32> to vector<4x1x8x32xf32>
    %44 = vector.broadcast %42 : vector<4x8x8x1xf32> to vector<4x8x8x32xf32>
    %45 = vector.broadcast %43 : vector<4x1x8x32xf32> to vector<4x8x8x32xf32>
    %46 = arith.mulf %44, %45 : vector<4x8x8x32xf32>
    %cst_16 = arith.constant dense<0.000000e+00> : vector<4x8x32xf32>
    %47 = vector.multi_reduction <add>, %46, %cst_16 [2] : vector<4x8x8x32xf32> to vector<4x8x32xf32>
    %48 = arith.addf %47, %11 : vector<4x8x32xf32>
    %49 = vector.shape_cast %5 : vector<1x32xf32> to vector<1x1x32xf32>
    %50 = vector.broadcast %49 : vector<1x1x32xf32> to vector<4x8x32xf32>
    %51 = arith.addf %48, %50 : vector<4x8x32xf32>
    %cst_17 = arith.constant 0.000000e+00 : f32
    %52 = vector.broadcast %cst_17 : f32 to vector<4x8x32xf32>
    %53 = arith.cmpf ogt, %51, %52 : vector<4x8x32xf32>
    %54 = math.exp %51 : vector<4x8x32xf32>
    %cst_18 = arith.constant 1.000000e+00 : f32
    %55 = vector.broadcast %cst_18 : f32 to vector<4x8x32xf32>
    %56 = arith.subf %54, %55 : vector<4x8x32xf32>
    %cst_19 = arith.constant 1.67326319 : f32
    %57 = vector.broadcast %cst_19 : f32 to vector<4x8x32xf32>
    %58 = arith.mulf %57, %56 : vector<4x8x32xf32>
    %59 = arith.select %53, %51, %58 : vector<4x8x32xi1>, vector<4x8x32xf32>
    %cst_20 = arith.constant 1.05070102 : f32
    %60 = vector.broadcast %cst_20 : f32 to vector<4x8x32xf32>
    %61 = arith.mulf %60, %59 : vector<4x8x32xf32>
    %c0_21 = arith.constant 0 : index
    %c0_22 = arith.constant 0 : index
    %c0_23 = arith.constant 0 : index
    %62 = vector.load %arg7[%c0_21, %c0_22, %c0_23] : memref<4x8x32xf32, #tpu.memory_space<vmem>>, vector<4x8x32xf32>
    tpu.vector_store %arg7[%c0_21, %c0_22, %c0_23], %61 {strides = array<i32>} : memref<4x8x32xf32, #tpu.memory_space<vmem>>, vector<4x8x32xf32>,
    return
  }
  func.func @transform_0(%arg0: i32, %arg1: i32) -> (i32, i32, i32) {
    %c0_i32 = arith.constant 0 : i32
    %c0_i32_0 = arith.constant 0 : i32
    return %arg0, %arg1, %c0_i32 : i32, i32, i32
  }
  func.func @transform_1(%arg0: i32, %arg1: i32) -> (i32, i32, i32) {
    %c0_i32 = arith.constant 0 : i32
    %c0_i32_0 = arith.constant 0 : i32
    %c0_i32_1 = arith.constant 0 : i32
    return %arg0, %c0_i32, %c0_i32_0 : i32, i32, i32
  }
  func.func @transform_2(%arg0: i32, %arg1: i32) -> (i32, i32) {
    %c0_i32 = arith.constant 0 : i32
    %c0_i32_0 = arith.constant 0 : i32
    %c0_i32_1 = arith.constant 0 : i32
    return %c0_i32, %c0_i32_0 : i32, i32
  }
  func.func @transform_3(%arg0: i32, %arg1: i32) -> (i32, i32) {
    %c0_i32 = arith.constant 0 : i32
    %c0_i32_0 = arith.constant 0 : i32
    %c0_i32_1 = arith.constant 0 : i32
    return %c0_i32, %c0_i32_0 : i32, i32
  }
  func.func @transform_4(%arg0: i32, %arg1: i32) -> (i32, i32) {
    %c0_i32 = arith.constant 0 : i32
    %c0_i32_0 = arith.constant 0 : i32
    %c0_i32_1 = arith.constant 0 : i32
    return %c0_i32, %c0_i32_0 : i32, i32
  }
  func.func @transform_5(%arg0: i32, %arg1: i32) -> (i32, i32, i32) {
    %c0_i32 = arith.constant 0 : i32
    %c0_i32_0 = arith.constant 0 : i32
    return %arg0, %arg1, %c0_i32 : i32, i32, i32
  }
}

</mosaic_0001>

<bundles_post_ra>
// kernel: tpu_custom_call.1
= control target key start
LH: loop header
LB: loop body
LE: loop exit
PB: predicated region body
PF: predicated region fallthrough
CT: control target
= control target key end

     0   :  { %10 = vsyncpa [#allocation3], 0  ;;  %s3936_s0 = inlined_call_operand.hbm [shape: f32[4,8,32], index: 0, kind: input, shape index: {}]   ;;  %s3937_s1 = inlined_call_operand.hbm [shape: f32[4,8,32], index: 1, kind: input, shape index: {}]   ;;  %s3938_s2 = inlined_call_operand.hbm [shape: f32[32,32], index: 2, kind: input, shape index: {}]   ;;  %s3939_s3 = inlined_call_operand.hbm [shape: f32[32,64], index: 3, kind: input, shape index: {}]   ;;  %s3940_s4 = inlined_call_operand.hbm [shape: f32[3,32], index: 4, kind: input, shape index: {}]   ;;  %s3941_s5 = inlined_call_operand.hbm [shape: f32[4,8,32], index: 5, kind: output, shape index: {}]  }
   0x1   :  { %11 = vsyncpa [#allocation6], 0 }
   0x2   :  { %12 = vsyncpa [#allocation9], 0 }
   0x3   :  { %13 = vsyncpa [#allocation4], 0  ;;  %s31_s20 = sshll.u32 %s3937_s1, 4  ;;  %s2653_s21 = smov [#allocation5]   ;;  %s32_s20 = int_to_ptr.hbm [resolvable:$true] %s31_s20 }
   0x4   :  { %s33_s22 = sshll.u32 %s2653_s21, 4  ;;  %s57_s25 = sshll.u32 %s3939_s3, 4  ;;  %s34_s22 = int_to_ptr.vmem [resolvable:$true] %s33_s22  ;;  %s58_s25 = int_to_ptr.hbm [resolvable:$true] %s57_s25 }
   0x5   :  { %s2654_s26 = smov 128   ;;  %s2655_s27 = smov 8  }
   0x6   :  { %39 = dma.hbm_to_vmem [thread:$0]  %s32_s20, 512, %s34_s22, [#allocation6], %s2654_s26, %s2654_s26, %s2655_s27  }
   0x7   :  { %s2656_s28 = smov [#allocation8]   ;;  %s18_s1 = sshll.u32 %s3936_s0, 4  ;;  %s19_s1 = int_to_ptr.hbm [resolvable:$true] %s18_s1 }
   0x8   :  { %s59_s29 = sshll.u32 %s2656_s28, 4  ;;  %s44_s8 = sshll.u32 %s3938_s2, 4  ;;  %s60_s29 = int_to_ptr.vmem [resolvable:$true] %s59_s29  ;;  %s45_s8 = int_to_ptr.hbm [resolvable:$true] %s44_s8 }
   0x9   :  { %65 = dma.hbm_to_vmem [thread:$0]  %s58_s25, 512, %s60_s29, [#allocation9], %s2654_s26, %s2654_s26, %s2655_s27  }
   0xa   :  { %s2657_s9 = smov [#allocation2]   ;;  %s2658_s11 = smov [#allocation7]  }
   0xb   :  { %s20_s10 = sshll.u32 %s2657_s9, 4  ;;  %s46_s0 = sshll.u32 %s2658_s11, 4  ;;  %s21_s10 = int_to_ptr.vmem [resolvable:$true] %s20_s10  ;;  %s47_s0 = int_to_ptr.vmem [resolvable:$true] %s46_s0 }
   0xc   :  { %26 = dma.hbm_to_vmem [thread:$0]  %s19_s1, 512, %s21_s10, [#allocation3], %s2654_s26, %s2654_s26, %s2655_s27  }
   0xd   :  { %s71_s14 = sshll.u32 %s3940_s4, 4  ;;  %s2659_s2 = smov [#allocation10]   ;;  %s72_s14 = int_to_ptr.hbm [resolvable:$true] %s71_s14 }
   0xe   :  { %52 = dma.hbm_to_vmem [thread:$0]  %s45_s8, 512, %s47_s0, [#allocation6], %s2654_s26, %s2654_s26, %s2655_s27  }
   0xf   :  { %s73_s15 = sshll.u32 %s2659_s2, 4  ;;  %s74_s15 = int_to_ptr.vmem [resolvable:$true] %s73_s15 }
  0x10   :  { %76 = dma.hbm_to_vmem [thread:$0]  %s72_s14, 64, %s74_s15, [#allocation9]  }
  0x11   :  { %2645 = dma.done.wait [#allocation3], 512  }
  0x12   :  { %2646 = vsyncadd [#allocation3], 4294966784 }
  0x13   :  { %2647 = dma.done.wait [#allocation6], 1024  }
  0x14   :  { %2648 = vsyncadd [#allocation6], 4294966272 }
  0x15   :  { %2649 = dma.done.wait [#allocation9], 576  }
  0x16   :  { %2650 = vsyncadd [#allocation9], 4294966720  ;;  %v109_v0 = vld [vmem:[#allocation8 + $0x18] sm:$0xff]  ;;  %v108_v1 = vld [vmem:[#allocation8 + $0x10] sm:$0xff]  ;;  %vm110_vm0 = vcmask 261120   ;;  %s2660_s4 = smov 96  }
  0x17   :  { %135 = vmatpush.msra.mxu0 %v109_v0  ;;  %v107_v2 = vld [vmem:[#allocation8 + $0x8] sm:$0xff]  ;;  %v283_v3 = vld [vmem:[#allocation7 + $0x18] sm:$0xff]  ;;  %v106_v4 = vld [vmem:[#allocation8] sm:$0xff]  ;;  %vm721_vm1 = vcmask 1041409   ;;  %vm723_vm2 = vcmask 1042434   ;;  %vm725_vm3 = vcmask 1043459  }
  0x18   :  { %2275 = vmatpush.msra.mxu1 %v283_v3  ;;  %v282_v5 = vld [vmem:[#allocation7 + $0x10] sm:$0xff]  ;;  %v281_v6 = vld [vmem:[#allocation7 + $0x8] sm:$0xff]  ;;  %2276 = vmatpush.msra.mxu2 %v283_v3  ;;  %v2720_v7 = vld [vmem:[#allocation2] sm:$0xff]  ;;  %vm729_vm4 = vcmask 1045509   ;;  %vm727_vm5 = vcmask 1044484   ;;  %vm731_vm6 = vcmask 1046534  }
  0x19   :  { %136 = vmatpush.msra.mxu0 %v108_v1  ;;  %v2722_v8 = vld [vmem:[#allocation2 + $0x8] sm:$0xff]  ;;  %2277 = vmatpush.msra.mxu3 %v283_v3  ;;  %v2724_v9 = vld [vmem:[#allocation2 + $0x10] sm:$0xff]  ;;  %v2726_v10 = vld [vmem:[#allocation5] sm:$0xff]  ;;  %v160_v11 = vrot.slane %v2720_v7, 5  ;;  %v161_v17 = vrot.slane %v2720_v7, 6  ;;  %v162_v31 = vrot.slane %v2720_v7, 7 }
  0x1a   :  { %2278 = vmatpush.msra.mxu1 %v282_v5  ;;  %v168_v12 = vrot.slane %v2722_v8, 6  ;;  %2279 = vmatpush.msra.mxu2 %v282_v5  ;;  %v280_v13 = vld [vmem:[#allocation7] sm:$0xff]  ;;  %v176_v14 = vrot.slane %v2724_v9, 7  ;;  %v169_v18 = vrot.slane %v2722_v8, 7  ;;  %v2735_v19 = vld [vmem:[#allocation5 + $0x8] sm:$0xff]  ;;  %v2737_v21 = vld [vmem:[#allocation5 + $0x10] sm:$0xff] }
  0x1b   :  { %137 = vmatpush.msra.mxu0 %v107_v2  ;;  %2280 = vmatpush.msra.mxu3 %v282_v5  ;;  %v189_v15 = vperm.slane %v160_v11, 0  ;;  %v2742_v25 = vld [vmem:[#allocation2 + $0x18] sm:$0xff]  ;;  %v190_v26 = vperm.slane %v161_v17, 0  ;;  %v191_v35 = vperm.slane %v162_v31, 0  ;;  %v200_v36 = vperm.slane %v2724_v9, 0  ;;  %s2662_s16 = smov [#allocation11]  }
  0x1c   :  { %2281 = vmatpush.msra.mxu1 %v281_v6  ;;  %v198_v16 = vperm.slane %v168_v12, 0  ;;  %2282 = vmatpush.msra.mxu2 %v281_v6  ;;  %v207_v20 = vperm.slane %v176_v14, 0  ;;  %v199_v27 = vperm.slane %v169_v18, 0  ;;  %v208_v28 = vperm.slane %v2742_v25, 0  ;;  %v2753_v32 = vld [vmem:[#allocation5 + $0x18] sm:$0xff]  ;;  %s2190_s17 = sshll.u32 %s2662_s16, 4  ;;  %s2191_s17 = int_to_ptr.vmem [resolvable:$true] %s2190_s17 }
  0x1d   :  { %138 = vmatpush.msra.mxu0 %v106_v4  ;;  %v253_v22 = vmul.f32 %v189_v15, %v2726_v10  ;;  %2283 = vmatpush.msra.mxu3 %v281_v6  ;;  %v254_v29 = vmul.f32 %v190_v26, %v2726_v10  ;;  %v177_v34 = vrot.slane %v2742_v25, 1  ;;  %v255_v38 = vmul.f32 %v191_v35, %v2726_v10  ;;  %s2192_s20 = sshll.u32 %s3941_s5, 4  ;;  %s2193_s20 = int_to_ptr.hbm [resolvable:$true] %s2192_s20 }
  0x1e   :  { %2207 = vmatmul.msk.f32.vlgmr.msra.gmra.mxu0 %vm110_vm0, %v2726_v10  ;;  %2284 = vmatpush.msra.mxu1 %v280_v13  ;;  %v262_v23 = vmul.f32 %v198_v16, %v2735_v19  ;;  %v271_v24 = vmul.f32 %v207_v20, %v2737_v21  ;;  %v263_v30 = vmul.f32 %v199_v27, %v2735_v19  ;;  %v192_v41 = vperm.slane %v2722_v8, 0 }
  0x1f   :  { %2285 = vmatpush.msra.mxu2 %v280_v13  ;;  %393 = vmatpush.msrb.mxu0 %v283_v3  ;;  %v272_v33 = vmul.f32 %v208_v28, %v2753_v32  ;;  %v209_v37 = vperm.slane %v177_v34, 0  ;;  %v264_v39 = vmul.f32 %v200_v36, %v2737_v21  ;;  %v170_v42 = vrot.slane %v2724_v9, 1 }
  0x20   :  { %2216 = vmatmul.msk.f32.vlgmr.msra.gmra.mxu1 %vm110_vm0, %v253_v22  ;;  %2225 = vmatmul.msk.f32.vlgmr.msra.gmra.mxu2 %vm110_vm0, %v262_v23  ;;  %v256_v43 = vmul.f32 %v192_v41, %v2735_v19  ;;  %v163_v46 = vrot.slane %v2722_v8, 1  ;;  %v171_v48 = vrot.slane %v2724_v9, 2  ;;  %v178_v49 = vrot.slane %v2742_v25, 2 }
  0x21   :  { %2286 = vmatpush.msra.mxu3 %v280_v13  ;;  %394 = vmatpush.msrb.mxu0 %v282_v5  ;;  %v273_v40 = vmul.f32 %v209_v37, %v2753_v32  ;;  %v201_v44 = vperm.slane %v170_v42, 0  ;;  %v184_v55 = vperm.slane %v2720_v7, 0  ;;  %v164_v57 = vrot.slane %v2722_v8, 2 }
  0x22   :  { %2234 = vmatmul.msk.f32.vlgmr.msra.gmra.mxu3 %vm110_vm0, %v271_v24  ;;  %v193_v47 = vperm.slane %v163_v46, 0  ;;  %v202_v51 = vperm.slane %v171_v48, 0  ;;  %v210_v52 = vperm.slane %v178_v49, 0  ;;  %v172_v59 = vrot.slane %v2724_v9, 3 }
  0x23   :  { %395 = vmatpush.msrb.mxu0 %v281_v6  ;;  %v265_v45 = vmul.f32 %v201_v44, %v2737_v21  ;;  %v248_v56 = vmul.f32 %v184_v55, %v2726_v10  ;;  %v194_v58 = vperm.slane %v164_v57, 0  ;;  %v179_v60 = vrot.slane %v2742_v25, 3 }
  0x24   :  { %v257_v50 = vmul.f32 %v193_v47, %v2735_v19  ;;  %v266_v53 = vmul.f32 %v202_v51, %v2737_v21  ;;  %v274_v54 = vmul.f32 %v210_v52, %v2753_v32  ;;  %v203_v1 = vperm.slane %v172_v59, 0 }
  0x25   :  { %396 = vmatpush.msrb.mxu0 %v280_v13  ;;  %v258_v0 = vmul.f32 %v194_v58, %v2735_v19  ;;  %v211_v2 = vperm.slane %v179_v60, 0  ;;  %v180_v6 = vrot.slane %v2742_v25, 4  ;;  %v156_v14 = vrot.slane %v2720_v7, 1 }
  0x26   :  { %2208 = vmatmul.msk.f32.gmra.mxu0 %vm110_vm0, %v2735_v19  ;;  %v267_v3 = vmul.f32 %v203_v1, %v2737_v21  ;;  %v157_v23 = vrot.slane %v2720_v7, 2  ;;  %v165_v24 = vrot.slane %v2722_v8, 3  ;;  %v173_v31 = vrot.slane %v2724_v9, 4 }
  0x27   :  { %v275_v4 = vmul.f32 %v211_v2, %v2753_v32  ;;  %v212_v13 = vperm.slane %v180_v6, 0  ;;  %v185_v16 = vperm.slane %v156_v14, 0  ;;  %v158_v37 = vrot.slane %v2720_v7, 3 }
  0x28   :  { %2217 = vmatmul.msk.f32.gmra.mxu1 %vm110_vm0, %v254_v29  ;;  %2226 = vmatmul.msk.f32.gmra.mxu2 %vm110_vm0, %v263_v30  ;;  %v186_v26 = vperm.slane %v157_v23, 0  ;;  %v195_v27 = vperm.slane %v165_v24, 0  ;;  %v204_v35 = vperm.slane %v173_v31, 0  ;;  %v182_v46 = vrot.slane %v2742_v25, 6 }
  0x29   :  { %v276_v15 = vmul.f32 %v212_v13, %v2753_v32  ;;  %v249_v20 = vmul.f32 %v185_v16, %v2726_v10  ;;  %v187_v41 = vperm.slane %v158_v37, 0  ;;  %vm733_vm7 = vcmask 1047559  }
  0x2a   :  { %2235 = vmatmul.msk.f32.gmra.mxu3 %vm110_vm0, %v272_v33  ;;  %v250_v29 = vmul.f32 %v186_v26, %v2726_v10  ;;  %v259_v30 = vmul.f32 %v195_v27, %v2735_v19  ;;  %v268_v36 = vmul.f32 %v204_v35, %v2737_v21  ;;  %v214_v55 = vperm.slane %v182_v46, 0 }
  0x2b   :  { %v251_v49 = vmul.f32 %v187_v41, %v2726_v10  ;;  %vm760_vm8 = vcmask 64512  }
  0x2c   :  { %v278_v58 = vmul.f32 %v214_v55, %v2753_v32 }
  0x2e   :  { %2209 = vmatmul.msk.f32.gmra.mxu0 %vm110_vm0, %v2737_v21 }
  0x30   :  { %2218 = vmatmul.msk.f32.gmra.mxu1 %vm110_vm0, %v255_v38  ;;  %2227 = vmatmul.msk.f32.gmra.mxu2 %vm110_vm0, %v264_v39  ;;  %v166_v38 = vrot.slane %v2722_v8, 4  ;;  %v174_v39 = vrot.slane %v2724_v9, 5 }
  0x32   :  { %2236 = vmatmul.msk.f32.gmra.mxu3 %vm110_vm0, %v273_v40  ;;  %v181_v40 = vrot.slane %v2742_v25, 5  ;;  %v196_v42 = vperm.slane %v166_v38, 0 }
  0x34   :  { %v213_v44 = vperm.slane %v181_v40, 0 }
  0x36   :  { %2210 = vmatmul.msk.f32.gmra.mxu0 %vm110_vm0, %v2753_v32  ;;  %v277_v51 = vmul.f32 %v213_v44, %v2753_v32 }
  0x38   :  { %2219 = vmatmul.msk.f32.gmra.mxu1 %vm110_vm0, %v256_v43  ;;  %2228 = vmatmul.msk.f32.gmra.mxu2 %vm110_vm0, %v265_v45  ;;  %v205_v43 = vperm.slane %v174_v39, 0  ;;  %v167_v45 = vrot.slane %v2722_v8, 5 }
  0x3a   :  { %2237 = vmatmul.msk.f32.gmra.mxu3 %vm110_vm0, %v274_v54  ;;  %v269_v8 = vmul.f32 %v205_v43, %v2737_v21  ;;  %v197_v54 = vperm.slane %v167_v45, 0 }
  0x3c   :  { %v261_v57 = vmul.f32 %v197_v54, %v2735_v19 }
  0x3e   :  { %2211 = vmatmul.msk.f32.vlgmr.msrb.gmra.mxu0 %vm110_vm0, %v248_v56 }
  0x40   :  { %2220 = vmatmul.msk.f32.gmra.mxu1 %vm110_vm0, %v257_v50  ;;  %2229 = vmatmul.msk.f32.gmra.mxu2 %vm110_vm0, %v266_v53  ;;  %v260_v50 = vmul.f32 %v196_v42, %v2735_v19  ;;  %v175_v53 = vrot.slane %v2724_v9, 6 }
  0x42   :  { %2238 = vmatmul.msk.f32.gmra.mxu3 %vm110_vm0, %v275_v4  ;;  %v206_v56 = vperm.slane %v175_v53, 0 }
  0x46   :  { %2212 = vmatmul.msk.f32.gmra.mxu0 %vm110_vm0, %v249_v20 }
  0x48   :  { %2221 = vmatmul.msk.f32.gmra.mxu1 %vm110_vm0, %v258_v0  ;;  %2230 = vmatmul.msk.f32.gmra.mxu2 %vm110_vm0, %v267_v3  ;;  %v183_v0 = vrot.slane %v2742_v25, 7  ;;  %v159_v3 = vrot.slane %v2720_v7, 4 }
  0x4a   :  { %2239 = vmatmul.msk.f32.gmra.mxu3 %vm110_vm0, %v276_v15  ;;  %v215_v1 = vperm.slane %v183_v0, 0  ;;  %v188_v4 = vperm.slane %v159_v3, 0 }
  0x4c   :  { %v252_v6 = vmul.f32 %v188_v4, %v2726_v10 }
  0x4e   :  { %2213 = vmatmul.msk.f32.gmra.mxu0 %vm110_vm0, %v250_v29 }
  0x50   :  { %2222 = vmatmul.msk.f32.gmra.mxu1 %vm110_vm0, %v259_v30  ;;  %2231 = vmatmul.msk.f32.gmra.mxu2 %vm110_vm0, %v268_v36 }
  0x52   :  { %2240 = vmatmul.msk.f32.gmra.mxu3 %vm110_vm0, %v277_v51 }
  0x56   :  { %2214 = vmatmul.msk.f32.gmra.mxu0 %vm110_vm0, %v251_v49 }
  0x58   :  { %2223 = vmatmul.msk.f32.gmra.mxu1 %vm110_vm0, %v260_v50  ;;  %2232 = vmatmul.msk.f32.gmra.mxu2 %vm110_vm0, %v269_v8 }
  0x5a   :  { %2241 = vmatmul.msk.f32.gmra.mxu3 %vm110_vm0, %v278_v58 }
  0x5e   :  { %2215 = vmatmul.msk.f32.gmra.mxu0 %vm110_vm0, %v252_v6 }
  0x60   :  { %2224 = vmatmul.msk.f32.gmra.mxu1 %vm110_vm0, %v261_v57 }
  0x9b   :  { %v2792_v61 = vpop.f32.mrf.mxu0 }
  0x9c   :  { %1705 = vrot.lane.b32.xlu2 %v2792_v61, %s2660_s4  ;;  %v1678_v62 = vrot.slane %v2792_v61, 2  ;;  %v1677_v63 = vrot.slane %v2792_v61, 1  ;;  %v1679_v5 = vrot.slane %v2792_v61, 3  ;;  %v1681_v11 = vrot.slane %v2792_v61, 5 }
  0x9d   :  { %v1680_v12 = vrot.slane %v2792_v61, 4  ;;  %v1682_v18 = vrot.slane %v2792_v61, 6  ;;  %v1683_v22 = vrot.slane %v2792_v61, 7  ;;  %v413_v2 = vpop.f32.mrf.mxu1 }
  0x9e   :  { %1709 = vrot.lane.b32.xlu0 %v1678_v62, %s2660_s4  ;;  %1707 = vrot.lane.b32.xlu1 %v1677_v63, %s2660_s4  ;;  %v270_v62 = vmul.f32 %v206_v56, %v2737_v21  ;;  %v279_v21 = vmul.f32 %v215_v1, %v2753_v32 }
  0xa0   :  { %2233 = vmatmul.msk.f32.gmra.mxu2 %vm110_vm0, %v270_v62  ;;  %2242 = vmatmul.msk.f32.gmra.mxu3 %vm110_vm0, %v279_v21 }
  0xa3   :  { %v2815_v17 = vpop.f32.mrf.mxu0 }
  0xa4   :  { %1711 = vrot.lane.b32.xlu2 %v1679_v5, %s2660_s4  ;;  %v1684_v28 = vrot.slane %v2815_v17, 1  ;;  %v1687_v34 = vrot.slane %v2815_v17, 4  ;;  %v1685_v47 = vrot.slane %v2815_v17, 2  ;;  %v1688_v52 = vrot.slane %v2815_v17, 5 }
  0xa5   :  { %v1686_v59 = vrot.slane %v2815_v17, 3  ;;  %v416_v13 = vpop.f32.mrf.mxu1  ;;  %v467_v14 = vpop.f32.mrf.mxu3 }
  0xa6   :  { %1715 = vrot.lane.b32.xlu0 %v1681_v11, %s2660_s4  ;;  %1713 = vrot.lane.b32.xlu1 %v1680_v12, %s2660_s4  ;;  %v105_v11 = vld [vmem:[#allocation10] sm:$0x7]  ;;  %v440_v12 = vpop.f32.mrf.mxu2 }
  0xa7   :  { %v2888_v25 = vperm.slane %v105_v11, 0 }
  0xa9   :  { %v414_v32 = vadd.f32 %v413_v2, %v2888_v25  ;;  %v417_v7 = vadd.f32 %v416_v13, %v2888_v25  ;;  %v441_v16 = vadd.f32 %v440_v12, %v2888_v25 }
  0xab   :  { %v2832_v33 = vpop.f32.mrf.mxu0  ;;  %2300 = vtanh.f32 %v414_v32 }
  0xac   :  { %1717 = vrot.lane.b32.xlu2 %v1682_v18, %s2660_s4  ;;  %v1691_v48 = vrot.slane %v2832_v33, 1  ;;  %v1693_v9 = vrot.slane %v2832_v33, 3  ;;  %v1692_v60 = vrot.slane %v2832_v33, 2  ;;  %2302 = vtanh.f32 %v417_v7 }
  0xad   :  { %v2894_v18 = vperm.slane %v105_v11, 1  ;;  %2304 = vtanh.f32 %v441_v16  ;;  %v419_v24 = vpop.f32.mrf.mxu1  ;;  %v470_v27 = vpop.f32.mrf.mxu3  ;;  %v1695_v1 = vrot.slane %v2832_v33, 5 }
  0xae   :  { %1719 = vrot.lane.b32.xlu1 %v1683_v22, %s2660_s4  ;;  %1721 = vrot.lane.b32.xlu0 %v2815_v17, %s2660_s4  ;;  %v443_v15 = vpop.f32.mrf.mxu2  ;;  %v420_v29 = vadd.f32 %v419_v24, %v2888_v25  ;;  %v471_v31 = vadd.f32 %v470_v27, %v2888_v25 }
  0xaf   :  { %v444_v10 = vadd.f32 %v443_v15, %v2888_v25 }
  0xb1   :  { %v2301_v20 = vpop.eup %2300  ;;  %2306 = vtanh.f32 %v444_v10 }
  0xb2   :  { %v2303_v22 = vpop.eup %2302  ;;  %v532_v23 = vmul.f32 %v2301_v20, %v2894_v18 }
  0xb3   :  { %v2875_v19 = vpop.f32.mrf.mxu0  ;;  %v533_v26 = vmul.f32 %v2303_v22, %v2894_v18 }
  0xb4   :  { %1723 = vrot.lane.b32.xlu2 %v1684_v28, %s2660_s4  ;;  %v1700_v63 = vrot.slane %v2875_v19, 3  ;;  %v1701_v5 = vrot.slane %v2875_v19, 4  ;;  %v468_v28 = vadd.f32 %v467_v14, %v2888_v25  ;;  %v574_v30 = vsel %vm110_vm0, %v532_v23, 0.0 }
  0xb5   :  { %v577_v35 = vsel %vm110_vm0, %v533_v26, 0.0  ;;  %v473_v49 = vpop.f32.mrf.mxu3  ;;  %v422_v58 = vpop.f32.mrf.mxu1  ;;  %v1699_v0 = vrot.slane %v2875_v19, 2 }
  0xb6   :  { %1729 = vrot.lane.b32.xlu0 %v1687_v34, %s2660_s4  ;;  %1737 = vrot.lane.b32.xlu1 %v2832_v33, %s2660_s4  ;;  %v2305_v34 = vpop.eup %2304  ;;  %2308 = vtanh.f32 %v468_v28  ;;  %v446_v39 = vpop.f32.mrf.mxu2  ;;  %v474_v51 = vadd.f32 %v473_v49, %v2888_v25 }
  0xb7   :  { %v2307_v36 = vpop.eup %2306  ;;  %2310 = vtanh.f32 %v420_v29  ;;  %v541_v37 = vmul.f32 %v2305_v34, %v2894_v18  ;;  %v447_v42 = vadd.f32 %v446_v39, %v2888_v25 }
  0xb8   :  { %2312 = vtanh.f32 %v471_v31  ;;  %v542_v38 = vmul.f32 %v2307_v36, %v2894_v18 }
  0xb9   :  { %v601_v41 = vsel %vm110_vm0, %v541_v37, 0.0  ;;  %2314 = vtanh.f32 %v447_v42  ;;  %v423_v37 = vadd.f32 %v422_v58, %v2888_v25 }
  0xba   :  { %v604_v44 = vsel %vm110_vm0, %v542_v38, 0.0  ;;  %2316 = vtanh.f32 %v474_v51 }
  0xbc   :  { %1725 = vrot.lane.b32.xlu2 %v1685_v47, %s2660_s4  ;;  %v2309_v40 = vpop.eup %2308 }
  0xbd   :  { %v2311_v43 = vpop.eup %2310  ;;  %v550_v46 = vmul.f32 %v2309_v40, %v2894_v18  ;;  %v425_v62 = vpop.f32.mrf.mxu1 }
  0xbe   :  { %1731 = vrot.lane.b32.xlu0 %v1688_v52, %s2660_s4  ;;  %1739 = vrot.lane.b32.xlu1 %v1691_v48, %s2660_s4  ;;  %v2313_v45 = vpop.eup %2312  ;;  %v534_v48 = vmul.f32 %v2311_v43, %v2894_v18  ;;  %v2925_v2 = vpop.f32.mrf.mxu3  ;;  %v426_v40 = vadd.f32 %v425_v62, %v2888_v25 }
  0xbf   :  { %v551_v47 = vmul.f32 %v2313_v45, %v2894_v18  ;;  %v628_v50 = vsel %vm110_vm0, %v550_v46, 0.0  ;;  %v2315_v53 = vpop.eup %2314 }
  0xc0   :  { %v580_v8 = vsel %vm110_vm0, %v534_v48, 0.0  ;;  %v543_v54 = vmul.f32 %v2315_v53, %v2894_v18  ;;  %v2317_v56 = vpop.eup %2316 }
  0xc1   :  { %v631_v52 = vsel %vm110_vm0, %v551_v47, 0.0  ;;  %v552_v57 = vmul.f32 %v2317_v56, %v2894_v18 }
  0xc2   :  { %v607_v55 = vsel %vm110_vm0, %v543_v54, 0.0 }
  0xc4   :  { %1727 = vrot.lane.b32.xlu2 %v1686_v59, %s2660_s4  ;;  %v634_v59 = vsel %vm110_vm0, %v552_v57, 0.0 }
  0xc5   :  { %v428_v3 = vpop.f32.mrf.mxu1 }
  0xc6   :  { %1743 = vrot.lane.b32.xlu0 %v1693_v9, %s2660_s4  ;;  %1741 = vrot.lane.b32.xlu1 %v1692_v60, %s2660_s4  ;;  %v1698_v9 = vrot.slane %v2875_v19, 1  ;;  %v1694_v60 = vrot.slane %v2832_v33, 4  ;;  %v429_v4 = vadd.f32 %v428_v3, %v2888_v25  ;;  %v2932_v12 = vpop.f32.mrf.mxu3 }
  0xc8   :  { %2318 = vtanh.f32 %v429_v4 }
  0xcd   :  { %v2944_v27 = vpop.f32.mrf.mxu1 }
  0xce   :  { %1759 = vrot.lane.b32.xlu1 %v1700_v63, %s2660_s4  ;;  %v449_v63 = vpop.f32.mrf.mxu2  ;;  %v2319_v6 = vpop.eup %2318 }
  0xcf   :  { %v537_v32 = vmul.f32 %v2319_v6, %v2894_v18  ;;  %v482_v15 = vpop.f32.mrf.mxu3  ;;  %v450_v48 = vadd.f32 %v449_v63, %v2888_v25  ;;  %v480_v63 = vadd.f32 %v2932_v12, %v2888_v25 }
  0xd0   :  { %v483_v10 = vadd.f32 %v482_v15, %v2888_v25 }
  0xd1   :  { %v589_v7 = vsel %vm110_vm0, %v537_v32, 0.0 }
  0xd5   :  { %v2949_v36 = vpop.f32.mrf.mxu1 }
  0xd6   :  { %1761 = vrot.lane.b32.xlu1 %v1701_v5, %s2660_s4  ;;  %v452_v21 = vpop.f32.mrf.mxu2  ;;  %v398_v5 = vpop.f32.mrf.mxu0 }
  0xd7   :  { %v399_v24 = vadd.f32 %v398_v5, %v2888_v25  ;;  %v2960_v45 = vpop.f32.mrf.mxu3 }
  0xdd   :  { %v437_v47 = vpop.f32.mrf.mxu1 }
  0xde   :  { %v455_v11 = vpop.f32.mrf.mxu2  ;;  %v2937_v14 = vpop.f32.mrf.mxu0 }
  0xdf   :  { %v456_v13 = vadd.f32 %v455_v11, %v2888_v25  ;;  %v2972_v58 = vpop.f32.mrf.mxu3  ;;  %v402_v32 = vadd.f32 %v2937_v14, %v2888_v25 }
  0xe1   :  { %2320 = vtanh.f32 %v456_v13 }
  0xe2   :  { %2322 = vtanh.f32 %v483_v10  ;;  %v432_v10 = vadd.f32 %v2944_v27, %v2888_v25 }
  0xe6   :  { %v404_v23 = vpop.f32.mrf.mxu0  ;;  %v2952_v38 = vpop.f32.mrf.mxu2 }
  0xe7   :  { %v2321_v16 = vpop.eup %2320  ;;  %v405_v26 = vadd.f32 %v404_v23, %v2888_v25 }
  0xe8   :  { %v546_v20 = vmul.f32 %v2321_v16, %v2894_v18  ;;  %v2323_v28 = vpop.eup %2322 }
  0xe9   :  { %2324 = vtanh.f32 %v405_v26  ;;  %v555_v29 = vmul.f32 %v2323_v28, %v2894_v18 }
  0xea   :  { %v616_v22 = vsel %vm110_vm0, %v546_v20, 0.0  ;;  %2326 = vtanh.f32 %v399_v24 }
  0xed   :  { %575 = vadd.xlane.f32.xlu2 %v574_v30  ;;  %v643_v30 = vsel %vm110_vm0, %v555_v29, 0.0 }
  0xee   :  { %v407_v31 = vpop.f32.mrf.mxu0  ;;  %v2965_v51 = vpop.f32.mrf.mxu2 }
  0xef   :  { %v2325_v34 = vpop.eup %2324 }
  0xf0   :  { %578 = vadd.xlane.f32.xlu0 %v577_v35  ;;  %v408_v35 = vadd.f32 %v407_v31, %v2888_v25  ;;  %v2327_v39 = vpop.eup %2326  ;;  %v459_v31 = vadd.f32 %v2952_v38, %v2888_v25 }
  0xf1   :  { %v527_v42 = vmul.f32 %v2327_v39, %v2894_v18 }
  0xf2   :  { %2328 = vtanh.f32 %v408_v35 }
  0xf3   :  { %2330 = vtanh.f32 %v423_v37  ;;  %v559_v49 = vsel %vm110_vm0, %v527_v42, 0.0  ;;  %v435_v37 = vadd.f32 %v2949_v36, %v2888_v25  ;;  %v486_v36 = vadd.f32 %v2960_v45, %v2888_v25 }
  0xf4   :  { %2332 = vtanh.f32 %v426_v40 }
  0xf5   :  { %602 = vadd.xlane.f32.xlu2 %v601_v41  ;;  %v529_v41 = vmul.f32 %v2325_v34, %v2894_v18 }
  0xf7   :  { %v565_v43 = vsel %vm110_vm0, %v529_v41, 0.0 }
  0xf8   :  { %605 = vadd.xlane.f32.xlu0 %v604_v44  ;;  %v2329_v46 = vpop.eup %2328 }
  0xf9   :  { %v530_v53 = vmul.f32 %v2329_v46, %v2894_v18 }
  0xfd   :  { %629 = vadd.xlane.f32.xlu2 %v628_v50  ;;  %v438_v50 = vadd.f32 %v437_v47, %v2888_v25 }
  0xff   :  { %2334 = vtanh.f32 %v438_v50  ;;  %v462_v50 = vadd.f32 %v2965_v51, %v2888_v25  ;;  %v489_v51 = vadd.f32 %v2972_v58, %v2888_v25 }
 0x100   :  { %632 = vadd.xlane.f32.xlu0 %v631_v52  ;;  %581 = vadd.xlane.f32.xlu1 %v580_v8  ;;  %v453_v52 = vadd.f32 %v452_v21, %v2888_v25  ;;  %v2331_v8 = vpop.eup %2330  ;;  %2336 = vtanh.f32 %v450_v48  ;;  %v2981_v21 = vpop.permute.xlu2 %1705 }
 0x101   :  { %v2333_v54 = vpop.eup %2332  ;;  %v535_v56 = vmul.f32 %v2331_v8, %v2894_v18  ;;  %3943 = vst [vmem:[#allocation17_spill] sm:$0xff] %v2981_v21 }
 0x102   :  { %2338 = vtanh.f32 %v453_v52  ;;  %v536_v57 = vmul.f32 %v2333_v54, %v2894_v18 }
 0x103   :  { %v583_v3 = vsel %vm110_vm0, %v535_v56, 0.0  ;;  %v410_v56 = vpop.f32.mrf.mxu0 }
 0x104   :  { %v586_v4 = vsel %vm110_vm0, %v536_v57, 0.0 }
 0x108   :  { %608 = vadd.xlane.f32.xlu1 %v607_v55  ;;  %v568_v55 = vsel %vm110_vm0, %v530_v53, 0.0  ;;  %v3001_v14 = vpop.permute.xlu2 %1711 }
 0x109   :  { %3946 = vst [vmem:[#allocation20_spill] sm:$0xff] %v3001_v14 }
 0x110   :  { %635 = vadd.xlane.f32.xlu1 %v634_v59  ;;  %v2958_v44 = vpop.permute.xlu1 %1707  ;;  %v2987_v11 = vpop.permute.xlu0 %1709 }
 0x111   :  { %3944 = vst [vmem:[#allocation18_spill] sm:$0xff] %v2987_v11  ;;  %v3018_v47 = vpop.permute.xlu2 %1717 }
 0x112   :  { %3948 = vst [vmem:[#allocation22_spill] sm:$0xff] %v3018_v47 }
 0x114   :  { %1755 = vrot.lane.b32.xlu0 %v1698_v9, %s2660_s4  ;;  %v2335_v9 = vpop.eup %2334 }
 0x115   :  { %1745 = vrot.lane.b32.xlu2 %v1694_v60, %s2660_s4  ;;  %v477_v60 = vadd.f32 %v2925_v2, %v2888_v25  ;;  %v540_v5 = vmul.f32 %v2335_v9, %v2894_v18 }
 0x117   :  { %v598_v2 = vsel %vm110_vm0, %v540_v5, 0.0 }
 0x118   :  { %590 = vadd.xlane.f32.xlu1 %v589_v7  ;;  %v2974_v59 = vpop.permute.xlu1 %1713  ;;  %v3008_v34 = vpop.permute.xlu0 %1715 }
 0x119   :  { %3942 = vst [vmem:[#allocation16_spill] sm:$0xff] %v2974_v59 }
 0x11c   :  { %1757 = vrot.lane.b32.xlu0 %v1699_v0, %s2660_s4 }
 0x11d   :  { %1747 = vrot.lane.b32.xlu2 %v1695_v1, %s2660_s4  ;;  %v2337_v1 = vpop.eup %2336 }
 0x11e   :  { %v2339_v6 = vpop.eup %2338  ;;  %v544_v12 = vmul.f32 %v2337_v1, %v2894_v18 }
 0x11f   :  { %v545_v13 = vmul.f32 %v2339_v6, %v2894_v18 }
 0x120   :  { %617 = vadd.xlane.f32.xlu1 %v616_v22  ;;  %v2993_v16 = vpop.permute.xlu1 %1719  ;;  %v610_v23 = vsel %vm110_vm0, %v544_v12, 0.0  ;;  %v3026_v8 = vpop.permute.xlu0 %1721 }
 0x121   :  { %3945 = vst [vmem:[#allocation19_spill] sm:$0xff] %v2993_v16  ;;  %v613_v24 = vsel %vm110_vm0, %v545_v13, 0.0 }
 0x123   :  { %v464_v62 = vpop.f32.mrf.mxu2  ;;  %v491_v7 = vpop.f32.mrf.mxu3 }
 0x124   :  { %v465_v0 = vadd.f32 %v464_v62, %v2888_v25  ;;  %v492_v20 = vadd.f32 %v491_v7, %v2888_v25 }
 0x125   :  { %1753 = vrot.lane.b32.xlu2 %v2875_v19, %s2660_s4 }
 0x126   :  { %2340 = vtanh.f32 %v465_v0 }
 0x127   :  { %2342 = vtanh.f32 %v477_v60  ;;  %v411_v60 = vadd.f32 %v410_v56, %v2888_v25 }
 0x128   :  { %644 = vadd.xlane.f32.xlu1 %v643_v30  ;;  %2344 = vtanh.f32 %v480_v63  ;;  %v3015_v46 = vpop.permute.xlu1 %1737  ;;  %v3037_v63 = vpop.permute.xlu2 %1723 }
 0x129   :  { %2346 = vtanh.f32 %v492_v20  ;;  %3947 = vst [vmem:[#allocation21_spill] sm:$0xff] %v3015_v46 }
 0x12a   :  { %2348 = vtanh.f32 %v402_v32 }
 0x12b   :  { %2350 = vtanh.f32 %v432_v10 }
 0x12c   :  { %v2341_v15 = vpop.eup %2340  ;;  %2352 = vtanh.f32 %v459_v31 }
 0x12d   :  { %v2343_v22 = vpop.eup %2342  ;;  %v549_v26 = vmul.f32 %v2341_v15, %v2894_v18  ;;  %2354 = vtanh.f32 %v435_v37 }
 0x12e   :  { %v2345_v28 = vpop.eup %2344  ;;  %v553_v27 = vmul.f32 %v2343_v22, %v2894_v18  ;;  %2356 = vtanh.f32 %v486_v36 }
 0x12f   :  { %v625_v29 = vsel %vm110_vm0, %v549_v26, 0.0  ;;  %v554_v30 = vmul.f32 %v2345_v28, %v2894_v18  ;;  %v2347_v35 = vpop.eup %2346  ;;  %2358 = vtanh.f32 %v462_v50 }
 0x130   :  { %566 = vadd.xlane.f32.xlu1 %v565_v43  ;;  %v2349_v39 = vpop.eup %2348  ;;  %v637_v40 = vsel %vm110_vm0, %v553_v27, 0.0  ;;  %v558_v42 = vmul.f32 %v2347_v35, %v2894_v18  ;;  %v3031_v57 = vpop.permute.xlu1 %1739  ;;  %2360 = vtanh.f32 %v489_v51 }
 0x131   :  { %v640_v41 = vsel %vm110_vm0, %v554_v30, 0.0  ;;  %v2351_v43 = vpop.eup %2350  ;;  %3949 = vst [vmem:[#allocation23_spill] sm:$0xff] %v3031_v57  ;;  %2362 = vtanh.f32 %v411_v60  ;;  %v3049_v32 = vpop.permute.xlu2 %1725 }
 0x132   :  { %v652_v38 = vsel %vm110_vm0, %v558_v42, 0.0  ;;  %v538_v48 = vmul.f32 %v2351_v43, %v2894_v18  ;;  %v2353_v52 = vpop.eup %2352 }
 0x133   :  { %v547_v45 = vmul.f32 %v2353_v52, %v2894_v18 }
 0x134   :  { %v592_v53 = vsel %vm110_vm0, %v538_v48, 0.0 }
 0x135   :  { %v619_v0 = vsel %vm110_vm0, %v547_v45, 0.0 }
 0x138   :  { %569 = vadd.xlane.f32.xlu1 %v568_v55  ;;  %v2355_v55 = vpop.eup %2354  ;;  %v3045_v6 = vpop.permute.xlu1 %1741 }
 0x139   :  { %v539_v9 = vmul.f32 %v2355_v55, %v2894_v18  ;;  %v2357_v62 = vpop.eup %2356  ;;  %3950 = vst [vmem:[#allocation24_spill] sm:$0xff] %v3045_v6 }
 0x13a   :  { %v2359_v1 = vpop.eup %2358  ;;  %v556_v58 = vmul.f32 %v2357_v62, %v2894_v18  ;;  %v687_v62 = vlaneseq }
 0x13b   :  { %v548_v5 = vmul.f32 %v2359_v1, %v2894_v18  ;;  %v2361_v25 = vpop.eup %2360 }
 0x13c   :  { %v2363_v13 = vpop.eup %2362  ;;  %v557_v15 = vmul.f32 %v2361_v25, %v2894_v18 }
 0x13d   :  { %v622_v12 = vsel %vm110_vm0, %v548_v5, 0.0  ;;  %v531_v7 = vmul.f32 %v2363_v13, %v2894_v18 }
 0x13f   :  { %v571_v22 = vsel %vm110_vm0, %v531_v7, 0.0 }
 0x140   :  { %599 = vadd.xlane.f32.xlu1 %v598_v2  ;;  %v646_v2 = vsel %vm110_vm0, %v556_v58, 0.0  ;;  %v3055_v20 = vpop.permute.xlu1 %1759 }
 0x141   :  { %3951 = vst [vmem:[#allocation25_spill] sm:$0xff] %v3055_v20 }
 0x146   :  { %560 = vadd.xlane.f32.xlu0 %v559_v49  ;;  %v528_v49 = vmul.f32 %v2349_v39, %v2894_v18 }
 0x148   :  { %626 = vadd.xlane.f32.xlu1 %v625_v29  ;;  %v562_v54 = vsel %vm110_vm0, %v528_v49, 0.0  ;;  %v3063_v28 = vpop.permute.xlu1 %1761 }
 0x149   :  { %3953 = vst [vmem:[#allocation27_spill] sm:$0xff] %v3063_v28 }
 0x14e   :  { %584 = vadd.xlane.f32.xlu2 %v583_v3  ;;  %587 = vadd.xlane.f32.xlu0 %v586_v4  ;;  %v595_v3 = vsel %vm110_vm0, %v539_v9, 0.0  ;;  %v3041_v4 = vpop.permute.xlu0 %1729 }
 0x150   :  { %653 = vadd.xlane.f32.xlu1 %v652_v38 }
 0x156   :  { %611 = vadd.xlane.f32.xlu2 %v610_v23  ;;  %614 = vadd.xlane.f32.xlu0 %v613_v24  ;;  %v3053_v10 = vpop.permute.xlu0 %1731  ;;  %v649_v23 = vsel %vm110_vm0, %v557_v15, 0.0  ;;  %v3059_v24 = vpop.permute.xlu2 %1727 }
 0x15e   :  { %638 = vadd.xlane.f32.xlu2 %v637_v40  ;;  %641 = vadd.xlane.f32.xlu0 %v640_v41  ;;  %v3061_v26 = vpop.permute.xlu0 %1743 }
 0x15f   :  { %3952 = vst [vmem:[#allocation26_spill] sm:$0xff] %v3061_v26 }
 0x160   :  { %v3065_v29 = vpop.xlane.xlu2 %575 }
 0x166   :  { %593 = vadd.xlane.f32.xlu2 %v592_v53  ;;  %563 = vadd.xlane.f32.xlu0 %v562_v54  ;;  %v3067_v27 = vpop.xlane.xlu0 %578 }
 0x168   :  { %v3071_v30 = vpop.xlane.xlu2 %602 }
 0x16e   :  { %620 = vadd.xlane.f32.xlu2 %v619_v0  ;;  %596 = vadd.xlane.f32.xlu0 %v595_v3  ;;  %v3073_v31 = vpop.xlane.xlu0 %605  ;;  %v3117_v0 = vand.u32 127, %v687_v62 }
 0x170   :  { %v3077_v37 = vpop.xlane.xlu2 %629  ;;  %v703_v6 = vperm.slane %v3071_v30, %v3117_v0  ;;  %v694_v57 = vperm.slane %v3065_v29, %v3117_v0 }
 0x173   :  { %v3069_v18 = vpop.xlane.xlu1 %581 }
 0x176   :  { %647 = vadd.xlane.f32.xlu2 %v646_v2  ;;  %623 = vadd.xlane.f32.xlu0 %v622_v12  ;;  %v3079_v39 = vpop.xlane.xlu0 %632 }
 0x178   :  { %v3083_v41 = vpop.permute.xlu2 %1745 }
 0x179   :  { %3954 = vst [vmem:[#allocation28_spill] sm:$0xff] %v3083_v41 }
 0x17b   :  { %v3075_v35 = vpop.xlane.xlu1 %608 }
 0x17c   :  { %v705_v15 = vperm.slane %v3075_v35, %v3117_v0 }
 0x17e   :  { %572 = vadd.xlane.f32.xlu2 %v571_v22  ;;  %650 = vadd.xlane.f32.xlu0 %v649_v23 }
 0x180   :  { %v3089_v38 = vpop.permute.xlu2 %1747 }
 0x181   :  { %3956 = vst [vmem:[#allocation30_spill] sm:$0xff] %v3089_v38 }
 0x183   :  { %v3081_v40 = vpop.xlane.xlu1 %635 }
 0x186   :  { %v3085_v42 = vpop.permute.xlu0 %1755 }
 0x187   :  { %3955 = vst [vmem:[#allocation29_spill] sm:$0xff] %v3085_v42 }
 0x188   :  { %v3095_v49 = vpop.permute.xlu2 %1753 }
 0x189   :  { %3958 = vst [vmem:[#allocation32_spill] sm:$0xff] %v3095_v49 }
 0x18b   :  { %v3087_v43 = vpop.xlane.xlu1 %590 }
 0x18c   :  { %v699_v13 = vperm.slane %v3087_v43, %v3117_v0 }
 0x18e   :  { %v3091_v36 = vpop.permute.xlu0 %1757 }
 0x18f   :  { %3957 = vst [vmem:[#allocation31_spill] sm:$0xff] %v3091_v36 }
 0x193   :  { %v3093_v48 = vpop.xlane.xlu1 %617 }
 0x19b   :  { %v3099_v52 = vpop.xlane.xlu1 %644 }
 0x1a3   :  { %v3105_v55 = vpop.xlane.xlu1 %566 }
 0x1a4   :  { %v691_v42 = vperm.slane %v3105_v55, %v3117_v0 }
 0x1ab   :  { %v3115_v60 = vpop.xlane.xlu1 %569 }
 0x1b3   :  { %v3127_v25 = vpop.xlane.xlu1 %599 }
 0x1b4   :  { %v702_v62 = vperm.slane %v3127_v25, %v3117_v0 }
 0x1b9   :  { %v3097_v50 = vpop.xlane.xlu0 %560 }
 0x1bb   :  { %v3158_v41 = vpop.xlane.xlu1 %626 }
 0x1c1   :  { %v3101_v53 = vpop.xlane.xlu2 %584  ;;  %v3103_v54 = vpop.xlane.xlu0 %587 }
 0x1c2   :  { %v697_v58 = vperm.slane %v3101_v53, %v3117_v0  ;;  %v698_v5 = vperm.slane %v3103_v54, %v3117_v0 }
 0x1c4   :  { %v735_v2 = vsel %vm721_vm1, %v698_v5, %v697_v58 }
 0x1c5   :  { %v736_v58 = vsel %vm723_vm2, %v699_v13, %v735_v2  ;;  %v704_v2 = vperm.slane %v3073_v31, %v3117_v0 }
 0x1c9   :  { %v3107_v45 = vpop.xlane.xlu2 %611  ;;  %v3109_v56 = vpop.xlane.xlu0 %614 }
 0x1ca   :  { %v706_v7 = vperm.slane %v3107_v45, %v3117_v0  ;;  %v707_v38 = vperm.slane %v3109_v56, %v3117_v0 }
 0x1cc   :  { %v742_v46 = vsel %vm721_vm1, %v706_v7, %v705_v15 }
 0x1d1   :  { %v3111_v51 = vpop.xlane.xlu2 %638  ;;  %v3113_v9 = vpop.xlane.xlu0 %641 }
 0x1d9   :  { %v3119_v1 = vpop.xlane.xlu2 %593  ;;  %v3121_v3 = vpop.xlane.xlu0 %563 }
 0x1da   :  { %v700_v12 = vperm.slane %v3119_v1, %v3117_v0 }
 0x1dc   :  { %v737_v26 = vsel %vm725_vm3, %v700_v12, %v736_v58  ;;  %v743_v12 = vsel %vm723_vm2, %v707_v38, %v742_v46  ;;  %v711_v46 = vperm.slane %v3158_v41, %v3117_v0 }
 0x1e1   :  { %v3138_v22 = vpop.xlane.xlu2 %620  ;;  %v3140_v23 = vpop.xlane.xlu0 %596 }
 0x1e2   :  { %v701_v5 = vperm.slane %v3140_v23, %v3117_v0  ;;  %v709_v58 = vperm.slane %v3138_v22, %v3117_v0 }
 0x1e4   :  { %v738_v20 = vsel %vm727_vm5, %v701_v5, %v737_v26  ;;  %v708_v26 = vperm.slane %v3093_v48, %v3117_v0  ;;  %v689_v5 = vperm.slane %v3097_v50, %v3117_v0 }
 0x1e5   :  { %v739_v13 = vsel %vm729_vm4, %v702_v62, %v738_v20  ;;  %v690_v20 = vperm.slane %v3121_v3, %v3117_v0 }
 0x1e6   :  { %v740_v28 = vsel %vm731_vm6, %v703_v6, %v739_v13  ;;  %v744_v38 = vsel %vm725_vm3, %v708_v26, %v743_v12  ;;  %v712_v13 = vperm.slane %v3077_v37, %v3117_v0  ;;  %v715_v26 = vperm.slane %v3111_v51, %v3117_v0 }
 0x1e7   :  { %v741_v7 = vsel %vm733_vm7, %v704_v2, %v740_v28  ;;  %v745_v2 = vsel %vm727_vm5, %v709_v58, %v744_v38  ;;  %v722_v49 = vsel %vm721_vm1, %v690_v20, %v689_v5  ;;  %v713_v38 = vperm.slane %v3079_v39, %v3117_v0 }
 0x1e8   :  { %v764_v15 = vsel %vm760_vm8, %v741_v7, -inf  ;;  %v724_v20 = vsel %vm723_vm2, %v691_v42, %v722_v49  ;;  %v716_v5 = vperm.slane %v3113_v9, %v3117_v0  ;;  %v695_v42 = vperm.slane %v3067_v27, %v3117_v0 }
 0x1e9   :  { %v3169_v62 = vpop.xlane.xlu2 %647  ;;  %765 = vmax.xlane.f32.xlu0 %v764_v15  ;;  %v3171_v6 = vpop.xlane.xlu0 %623  ;;  %v714_v15 = vperm.slane %v3081_v40, %v3117_v0 }
 0x1ea   :  { %v710_v28 = vperm.slane %v3171_v6, %v3117_v0 }
 0x1ec   :  { %v746_v7 = vsel %vm729_vm4, %v710_v28, %v745_v2  ;;  %v692_v28 = vperm.slane %v3115_v60, %v3117_v0 }
 0x1ed   :  { %v747_v12 = vsel %vm731_vm6, %v711_v46, %v746_v7  ;;  %v749_v46 = vsel %vm721_vm1, %v714_v15, %v713_v38  ;;  %v696_v15 = vperm.slane %v3069_v18, %v3117_v0  ;;  %v718_v38 = vperm.slane %v3169_v62, %v3117_v0 }
 0x1ee   :  { %v748_v58 = vsel %vm733_vm7, %v712_v13, %v747_v12  ;;  %v750_v13 = vsel %vm723_vm2, %v715_v26, %v749_v46  ;;  %v3225_v46 = vpop.xlane.xlu1 %653 }
 0x1ef   :  { %v767_v2 = vsel %vm760_vm8, %v748_v58, -inf  ;;  %v726_v58 = vsel %vm725_vm3, %v692_v28, %v724_v20  ;;  %v751_v26 = vsel %vm725_vm3, %v716_v5, %v750_v13  ;;  %v717_v28 = vperm.slane %v3099_v52, %v3117_v0 }
 0x1f0   :  { %768 = vmax.xlane.f32.xlu1 %v767_v2  ;;  %v720_v13 = vperm.slane %v3225_v46, %v3117_v0 }
 0x1f1   :  { %v3202_v7 = vpop.xlane.xlu2 %572  ;;  %v3210_v47 = vpop.xlane.xlu0 %650  ;;  %v752_v5 = vsel %vm727_vm5, %v717_v28, %v751_v26 }
 0x1f2   :  { %v693_v12 = vperm.slane %v3202_v7, %v3117_v0  ;;  %v719_v20 = vperm.slane %v3210_v47, %v3117_v0 }
 0x1f4   :  { %v728_v49 = vsel %vm727_vm5, %v693_v12, %v726_v58 }
 0x1f5   :  { %v730_v2 = vsel %vm729_vm4, %v694_v57, %v728_v49  ;;  %v753_v57 = vsel %vm729_vm4, %v718_v38, %v752_v5 }
 0x1f6   :  { %v732_v12 = vsel %vm731_vm6, %v695_v42, %v730_v2  ;;  %v754_v49 = vsel %vm731_vm6, %v719_v20, %v753_v57  ;;  %v2661_v42 = vmov 0  }
 0x1f7   :  { %v734_v58 = vsel %vm733_vm7, %v696_v15, %v732_v12  ;;  %v755_v59 = vsel %vm733_vm7, %v720_v13, %v754_v49  ;;  %2299 = vset.pattern.permute.xlu0 %v2661_v42  ;;  %2298 = vset.pattern.permute.xlu1 %v2661_v42 }
 0x1f8   :  { %v761_v16 = vsel %vm760_vm8, %v734_v58, -inf  ;;  %v770_v36 = vsel %vm760_vm8, %v755_v59, -inf  ;;  %2297 = vset.pattern.permute.xlu2 %v2661_v42 }
 0x1f9   :  { %762 = vmax.xlane.f32.xlu2 %v761_v16 }
 0x201   :  { %771 = vmax.xlane.f32.xlu2 %v770_v36 }
 0x25c   :  { %v766_v15 = vpop.xlane.xlu0 %765 }
 0x25d   :  { %v787_v2 = vperm.slane %v766_v15, 2  ;;  %v786_v26 = vperm.slane %v766_v15, 1  ;;  %v785_v28 = vperm.slane %v766_v15, 0  ;;  %v790_v20 = vperm.slane %v766_v15, 5 }
 0x25e   :  { %v789_v58 = vperm.slane %v766_v15, 4  ;;  %v788_v5 = vperm.slane %v766_v15, 3 }
 0x25f   :  { %v851_v12 = vsub.f32 %v3087_v43, %v787_v2  ;;  %v850_v16 = vsub.f32 %v3103_v54, %v786_v26  ;;  %v849_v38 = vsub.f32 %v3101_v53, %v785_v28  ;;  %v854_v57 = vsub.f32 %v3127_v25, %v790_v20 }
 0x260   :  { %v853_v49 = vsub.f32 %v3140_v23, %v789_v58  ;;  %v852_v42 = vsub.f32 %v3119_v1, %v788_v5  ;;  %v792_v54 = vperm.slane %v766_v15, 7  ;;  %v791_v28 = vperm.slane %v766_v15, 6 }
 0x261   :  { %v893_v13 = vmul.f32 1.442695, %v851_v12  ;;  %v891_v59 = vmul.f32 1.442695, %v850_v16  ;;  %v889_v36 = vmul.f32 1.442695, %v849_v38 }
 0x262   :  { %v899_v43 = vmul.f32 1.442695, %v854_v57  ;;  %v897_v2 = vmul.f32 1.442695, %v853_v49  ;;  %v895_v53 = vmul.f32 1.442695, %v852_v42  ;;  %v856_v1 = vsub.f32 %v3073_v31, %v792_v54 }
 0x263   :  { %2364 = vpow2.f32 %v893_v13  ;;  %v855_v16 = vsub.f32 %v3071_v30, %v791_v28 }
 0x264   :  { %2366 = vpow2.f32 %v891_v59  ;;  %v903_v20 = vmul.f32 1.442695, %v856_v1 }
 0x265   :  { %2368 = vpow2.f32 %v889_v36  ;;  %v901_v59 = vmul.f32 1.442695, %v855_v16 }
 0x266   :  { %2370 = vpow2.f32 %v899_v43 }
 0x267   :  { %2372 = vpow2.f32 %v897_v2 }
 0x268   :  { %2374 = vpow2.f32 %v895_v53 }
 0x269   :  { %v3243_v26 = vpop.eup %2364 }
 0x26a   :  { %v3245_v14 = vpop.eup %2366  ;;  %1000 = vperm.xlu0 %2299, %v3243_v26  }
 0x26b   :  { %v3248_v12 = vpop.eup %2368  ;;  %997 = vperm.xlu1 %2298, %v3245_v14  }
 0x26c   :  { %994 = vperm.xlu2 %2297, %v3248_v12   ;;  %v763_v25 = vpop.xlane.xlu2 %762  ;;  %v3255_v5 = vpop.eup %2370 }
 0x26d   :  { %v777_v23 = vperm.slane %v763_v25, 0  ;;  %v784_v38 = vperm.slane %v763_v25, 7  ;;  %v778_v58 = vperm.slane %v763_v25, 1  ;;  %v779_v36 = vperm.slane %v763_v25, 2  ;;  %v3257_v57 = vpop.eup %2372 }
 0x26e   :  { %v3260_v49 = vpop.eup %2374  ;;  %v781_v53 = vperm.slane %v763_v25, 4 }
 0x26f   :  { %v841_v15 = vsub.f32 %v3097_v50, %v777_v23  ;;  %v848_v30 = vsub.f32 %v3069_v18, %v784_v38  ;;  %v842_v50 = vsub.f32 %v3121_v3, %v778_v58  ;;  %v843_v42 = vsub.f32 %v3105_v55, %v779_v36 }
 0x270   :  { %v780_v23 = vperm.slane %v763_v25, 3  ;;  %v845_v3 = vsub.f32 %v3202_v7, %v781_v53 }
 0x271   :  { %v873_v13 = vmul.f32 1.442695, %v841_v15  ;;  %v887_v43 = vmul.f32 1.442695, %v848_v30  ;;  %v875_v54 = vmul.f32 1.442695, %v842_v50 }
 0x272   :  { %1009 = vperm.xlu0 %2299, %v3255_v5   ;;  %v877_v1 = vmul.f32 1.442695, %v843_v42  ;;  %v844_v15 = vsub.f32 %v3115_v60, %v780_v23  ;;  %v881_v58 = vmul.f32 1.442695, %v845_v3  ;;  %v782_v30 = vperm.slane %v763_v25, 5 }
 0x273   :  { %1006 = vperm.xlu1 %2298, %v3257_v57   ;;  %2376 = vpow2.f32 %v873_v13  ;;  %v783_v13 = vperm.slane %v763_v25, 6 }
 0x274   :  { %1003 = vperm.xlu2 %2297, %v3260_v49   ;;  %v3265_v31 = vpop.xlane.xlu2 %771  ;;  %2378 = vpow2.f32 %v903_v20  ;;  %v879_v36 = vmul.f32 1.442695, %v844_v15  ;;  %v846_v42 = vsub.f32 %v3065_v29, %v782_v30 }
 0x275   :  { %2380 = vpow2.f32 %v901_v59  ;;  %v802_v2 = vperm.slane %v3265_v31, 1  ;;  %v805_v20 = vperm.slane %v3265_v31, 4  ;;  %v847_v7 = vsub.f32 %v3067_v27, %v783_v13  ;;  %v3307_v27 = vpop.xlane.xlu1 %768 }
 0x276   :  { %2382 = vpow2.f32 %v887_v43  ;;  %v808_v43 = vperm.slane %v3265_v31, 7  ;;  %v803_v23 = vperm.slane %v3265_v31, 2  ;;  %v804_v13 = vperm.slane %v3265_v31, 3 }
 0x277   :  { %v866_v55 = vsub.f32 %v3081_v40, %v802_v2  ;;  %2384 = vpow2.f32 %v875_v54  ;;  %v869_v60 = vsub.f32 %v3099_v52, %v805_v20  ;;  %v885_v2 = vmul.f32 1.442695, %v847_v7 }
 0x278   :  { %2386 = vpow2.f32 %v877_v1  ;;  %v801_v54 = vperm.slane %v3265_v31, 0  ;;  %v883_v1 = vmul.f32 1.442695, %v846_v42  ;;  %v872_v29 = vsub.f32 %v3225_v46, %v808_v43 }
 0x279   :  { %v3270_v28 = vpop.eup %2376  ;;  %v923_v38 = vmul.f32 1.442695, %v866_v55  ;;  %v929_v25 = vmul.f32 1.442695, %v869_v60  ;;  %v867_v15 = vsub.f32 %v3111_v51, %v803_v23  ;;  %v793_v20 = vperm.slane %v3307_v27, 0 }
 0x27a   :  { %v3272_v18 = vpop.eup %2378  ;;  %970 = vperm.xlu0 %2299, %v3270_v28   ;;  %v865_v3 = vsub.f32 %v3079_v39, %v801_v54  ;;  %v806_v46 = vperm.slane %v3265_v31, 5  ;;  %v868_v51 = vsub.f32 %v3113_v9, %v804_v13  ;;  %v796_v43 = vperm.slane %v3307_v27, 3 }
 0x27b   :  { %v3275_v16 = vpop.eup %2380  ;;  %1015 = vperm.xlu1 %2298, %v3272_v18   ;;  %2388 = vpow2.f32 %v923_v38  ;;  %v935_v38 = vmul.f32 1.442695, %v872_v29  ;;  %v925_v30 = vmul.f32 1.442695, %v867_v15  ;;  %v857_v39 = vsub.f32 %v3075_v35, %v793_v20 }
 0x27c   :  { %1012 = vperm.xlu2 %2297, %v3275_v16   ;;  %v3283_v59 = vpop.eup %2382  ;;  %2390 = vpow2.f32 %v881_v58  ;;  %v921_v58 = vmul.f32 1.442695, %v865_v3  ;;  %v870_v42 = vsub.f32 %v3169_v62, %v806_v46  ;;  %v807_v54 = vperm.slane %v3265_v31, 6 }
 0x27d   :  { %v3285_v50 = vpop.eup %2384  ;;  %2392 = vpow2.f32 %v879_v36  ;;  %v794_v29 = vperm.slane %v3307_v27, 1  ;;  %v860_v9 = vsub.f32 %v3093_v48, %v796_v43  ;;  %v797_v46 = vperm.slane %v3307_v27, 4 }
 0x27e   :  { %v3288_v40 = vpop.eup %2386  ;;  %2394 = vpow2.f32 %v929_v25  ;;  %v905_v25 = vmul.f32 1.442695, %v857_v39  ;;  %v931_v23 = vmul.f32 1.442695, %v870_v42  ;;  %v871_v62 = vsub.f32 %v3210_v47, %v807_v54 }
 0x27f   :  { %2396 = vpow2.f32 %v885_v2  ;;  %v927_v2 = vmul.f32 1.442695, %v868_v51  ;;  %v858_v31 = vsub.f32 %v3107_v45, %v794_v29  ;;  %v911_v15 = vmul.f32 1.442695, %v860_v9 }
 0x280   :  { %2398 = vpow2.f32 %v883_v1  ;;  %v933_v20 = vmul.f32 1.442695, %v871_v62  ;;  %v861_v51 = vsub.f32 %v3138_v22, %v797_v46  ;;  %v798_v43 = vperm.slane %v3307_v27, 5 }
 0x281   :  { %v3297_v53 = vpop.eup %2388  ;;  %2400 = vpow2.f32 %v935_v38  ;;  %v799_v38 = vperm.slane %v3307_v27, 6 }
 0x282   :  { %991 = vperm.xlu0 %2299, %v3283_v59   ;;  %v3300_v52 = vpop.eup %2390  ;;  %2402 = vpow2.f32 %v921_v58  ;;  %v795_v58 = vperm.slane %v3307_v27, 2  ;;  %v913_v54 = vmul.f32 1.442695, %v861_v51 }
 0x283   :  { %973 = vperm.xlu1 %2298, %v3285_v50   ;;  %v3303_v55 = vpop.eup %2392  ;;  %2404 = vpow2.f32 %v925_v30  ;;  %v907_v30 = vmul.f32 1.442695, %v858_v31  ;;  %v863_v47 = vsub.f32 %v3158_v41, %v799_v38 }
 0x284   :  { %976 = vperm.xlu2 %2297, %v3288_v40   ;;  %v3314_v36 = vpop.eup %2394  ;;  %2406 = vpow2.f32 %v905_v25  ;;  %v859_v45 = vsub.f32 %v3109_v56, %v795_v58  ;;  %v862_v56 = vsub.f32 %v3171_v6, %v798_v43 }
 0x285   :  { %v3317_v60 = vpop.eup %2396  ;;  %2408 = vpow2.f32 %v927_v2  ;;  %v917_v42 = vmul.f32 1.442695, %v863_v47 }
 0x286   :  { %v3320_v7 = vpop.eup %2398  ;;  %2410 = vpow2.f32 %v931_v23  ;;  %v909_v25 = vmul.f32 1.442695, %v859_v45  ;;  %v800_v23 = vperm.slane %v3307_v27, 7  ;;  %v915_v9 = vmul.f32 1.442695, %v862_v56 }
 0x287   :  { %v3329_v1 = vpop.eup %2400  ;;  %2412 = vpow2.f32 %v911_v15 }
 0x288   :  { %v3332_v35 = vpop.eup %2402  ;;  %2414 = vpow2.f32 %v933_v20  ;;  %v864_v22 = vsub.f32 %v3077_v37, %v800_v23 }
 0x289   :  { %v3335_v3 = vpop.eup %2404  ;;  %2416 = vpow2.f32 %v907_v30 }
 0x28a   :  { %1045 = vperm.xlu0 %2299, %v3297_v53   ;;  %v3344_v13 = vpop.eup %2406  ;;  %2418 = vpow2.f32 %v917_v42  ;;  %v919_v27 = vmul.f32 1.442695, %v864_v22 }
 0x28b   :  { %982 = vperm.xlu1 %2298, %v3300_v52   ;;  %v3347_v48 = vpop.eup %2408  ;;  %2420 = vpow2.f32 %v909_v25 }
 0x28c   :  { %979 = vperm.xlu2 %2297, %v3303_v55   ;;  %v3350_v39 = vpop.eup %2410  ;;  %2422 = vpow2.f32 %v913_v54 }
 0x28d   :  { %v3358_v2 = vpop.eup %2412  ;;  %2424 = vpow2.f32 %v915_v9 }
 0x28e   :  { %v3361_v29 = vpop.eup %2414  ;;  %2426 = vpow2.f32 %v919_v27 }
 0x28f   :  { %v3364_v41 = vpop.eup %2416 }
 0x290   :  { %v3370_v62 = vpop.eup %2418 }
 0x291   :  { %v3372_v31 = vpop.eup %2420 }
 0x292   :  { %1054 = vperm.xlu0 %2299, %v3314_v36   ;;  %v3375_v15 = vpop.eup %2422 }
 0x293   :  { %988 = vperm.xlu1 %2298, %v3317_v60   ;;  %v3379_v6 = vpop.eup %2424 }
 0x294   :  { %985 = vperm.xlu2 %2297, %v3320_v7   ;;  %v3381_v38 = vpop.eup %2426 }
 0x29a   :  { %1063 = vperm.xlu0 %2299, %v3329_v1  }
 0x29b   :  { %1042 = vperm.xlu1 %2298, %v3332_v35  }
 0x29c   :  { %1048 = vperm.xlu2 %2297, %v3335_v3  }
 0x2a2   :  { %1018 = vperm.xlu0 %2299, %v3344_v13  }
 0x2a3   :  { %1051 = vperm.xlu1 %2298, %v3347_v48  }
 0x2a4   :  { %1057 = vperm.xlu2 %2297, %v3350_v39  }
 0x2aa   :  { %1027 = vperm.xlu0 %2299, %v3358_v2  }
 0x2ab   :  { %1060 = vperm.xlu1 %2298, %v3361_v29  }
 0x2ac   :  { %1021 = vperm.xlu2 %2297, %v3364_v41  }
 0x2b2   :  { %1036 = vperm.xlu0 %2299, %v3370_v62  }
 0x2b3   :  { %1024 = vperm.xlu1 %2298, %v3372_v31  }
 0x2b4   :  { %1030 = vperm.xlu2 %2297, %v3375_v15  }
 0x2bb   :  { %1033 = vperm.xlu1 %2298, %v3379_v6  }
 0x2bc   :  { %1039 = vperm.xlu2 %2297, %v3381_v38  }
 0x2c6   :  { %v995_v37 = vpop.permute.xlu2 %994 }
 0x2c7   :  { %v1073_v45 = vperm.slane %v995_v37, %v3117_v0 }
 0x2ce   :  { %v1004_v20 = vpop.permute.xlu2 %1003 }
 0x2cf   :  { %v1076_v23 = vperm.slane %v1004_v20, %v3117_v0 }
 0x2d6   :  { %v1013_v30 = vpop.permute.xlu2 %1012 }
 0x2dc   :  { %v1001_v58 = vpop.permute.xlu0 %1000 }
 0x2dd   :  { %v998_v46 = vpop.permute.xlu1 %997  ;;  %v1075_v51 = vperm.slane %v1001_v58, %v3117_v0 }
 0x2de   :  { %v1074_v47 = vperm.slane %v998_v46, %v3117_v0  ;;  %v977_v22 = vpop.permute.xlu2 %976 }
 0x2e0   :  { %v1104_v42 = vsel %vm721_vm1, %v1074_v47, %v1073_v45  ;;  %v1079_v47 = vperm.slane %v1013_v30, %v3117_v0 }
 0x2e1   :  { %v1105_v43 = vsel %vm723_vm2, %v1075_v51, %v1104_v42 }
 0x2e2   :  { %v1106_v27 = vsel %vm725_vm3, %v1076_v23, %v1105_v43 }
 0x2e4   :  { %v1010_v25 = vpop.permute.xlu0 %1009 }
 0x2e5   :  { %v1007_v54 = vpop.permute.xlu1 %1006  ;;  %v1078_v9 = vperm.slane %v1010_v25, %v3117_v0 }
 0x2e6   :  { %v1077_v56 = vperm.slane %v1007_v54, %v3117_v0  ;;  %v980_v54 = vpop.permute.xlu2 %979 }
 0x2e8   :  { %v1107_v46 = vsel %vm727_vm5, %v1077_v56, %v1106_v27 }
 0x2e9   :  { %v1108_v58 = vsel %vm729_vm4, %v1078_v9, %v1107_v46 }
 0x2ea   :  { %v1109_v42 = vsel %vm731_vm6, %v1079_v47, %v1108_v58 }
 0x2ec   :  { %v971_v37 = vpop.permute.xlu0 %970 }
 0x2ed   :  { %v1016_v45 = vpop.permute.xlu1 %1015  ;;  %v1065_v56 = vperm.slane %v971_v37, %v3117_v0 }
 0x2ee   :  { %v1080_v51 = vperm.slane %v1016_v45, %v3117_v0  ;;  %v986_v9 = vpop.permute.xlu2 %985  ;;  %v1067_v45 = vperm.slane %v977_v22, %v3117_v0 }
 0x2ef   :  { %v1070_v37 = vperm.slane %v986_v9, %v3117_v0 }
 0x2f0   :  { %v1110_v20 = vsel %vm733_vm7, %v1080_v51, %v1109_v42  ;;  %v1068_v51 = vperm.slane %v980_v54, %v3117_v0 }
 0x2f1   :  { %v1132_v21 = vsel %vm760_vm8, %v1110_v20, 0.0 }
 0x2f2   :  { %1133 = vadd.xlane.f32.xlu1 %v1132_v21 }
 0x2f4   :  { %v992_v25 = vpop.permute.xlu0 %991 }
 0x2f5   :  { %v974_v43 = vpop.permute.xlu1 %973 }
 0x2f6   :  { %v1066_v23 = vperm.slane %v974_v43, %v3117_v0  ;;  %v1049_v43 = vpop.permute.xlu2 %1048 }
 0x2f8   :  { %v1097_v30 = vsel %vm721_vm1, %v1066_v23, %v1065_v56  ;;  %v1072_v56 = vperm.slane %v992_v25, %v3117_v0  ;;  %v1091_v25 = vperm.slane %v1049_v43, %v3117_v0 }
 0x2f9   :  { %v1098_v58 = vsel %vm723_vm2, %v1067_v45, %v1097_v30 }
 0x2fa   :  { %v1099_v21 = vsel %vm725_vm3, %v1068_v51, %v1098_v58 }
 0x2fc   :  { %v1046_v27 = vpop.permute.xlu0 %1045 }
 0x2fd   :  { %v983_v46 = vpop.permute.xlu1 %982  ;;  %v1090_v51 = vperm.slane %v1046_v27, %v3117_v0 }
 0x2fe   :  { %v1069_v47 = vperm.slane %v983_v46, %v3117_v0 }
 0x300   :  { %v1100_v42 = vsel %vm727_vm5, %v1069_v47, %v1099_v21  ;;  %v1058_v47 = vpop.permute.xlu2 %1057 }
 0x301   :  { %v1101_v22 = vsel %vm729_vm4, %v1070_v37, %v1100_v42 }
 0x304   :  { %v1055_v20 = vpop.permute.xlu0 %1054 }
 0x305   :  { %v989_v11 = vpop.permute.xlu1 %988 }
 0x306   :  { %v1071_v23 = vperm.slane %v989_v11, %v3117_v0 }
 0x308   :  { %v1102_v30 = vsel %vm731_vm6, %v1071_v23, %v1101_v22 }
 0x309   :  { %v1103_v46 = vsel %vm733_vm7, %v1072_v56, %v1102_v30  ;;  %v1022_v56 = vpop.permute.xlu2 %1021  ;;  %v1093_v30 = vperm.slane %v1055_v20, %v3117_v0 }
 0x30a   :  { %v1129_v54 = vsel %vm760_vm8, %v1103_v46, 0.0 }
 0x30b   :  { %1130 = vadd.xlane.f32.xlu2 %v1129_v54  ;;  %v1094_v54 = vperm.slane %v1058_v47, %v3117_v0  ;;  %v1082_v47 = vperm.slane %v1022_v56, %v3117_v0 }
 0x30c   :  { %v1064_v58 = vpop.permute.xlu0 %1063 }
 0x30d   :  { %v1043_v45 = vpop.permute.xlu1 %1042 }
 0x30e   :  { %v1089_v9 = vperm.slane %v1043_v45, %v3117_v0 }
 0x310   :  { %v1118_v11 = vsel %vm721_vm1, %v1090_v51, %v1089_v9  ;;  %v1096_v9 = vperm.slane %v1064_v58, %v3117_v0 }
 0x311   :  { %v1119_v23 = vsel %vm723_vm2, %v1091_v25, %v1118_v11 }
 0x314   :  { %v1019_v37 = vpop.permute.xlu0 %1018 }
 0x315   :  { %v1052_v21 = vpop.permute.xlu1 %1051  ;;  %v1081_v20 = vperm.slane %v1019_v37, %v3117_v0 }
 0x316   :  { %v1092_v42 = vperm.slane %v1052_v21, %v3117_v0 }
 0x317   :  { %v1111_v58 = vsel %vm721_vm1, %v1082_v47, %v1081_v20 }
 0x318   :  { %v1120_v22 = vsel %vm725_vm3, %v1092_v42, %v1119_v23  ;;  %v1031_v42 = vpop.permute.xlu2 %1030 }
 0x319   :  { %v1121_v46 = vsel %vm727_vm5, %v1093_v30, %v1120_v22 }
 0x31a   :  { %v1122_v43 = vsel %vm729_vm4, %v1094_v54, %v1121_v46 }
 0x31c   :  { %v1028_v21 = vpop.permute.xlu0 %1027 }
 0x31d   :  { %v1061_v27 = vpop.permute.xlu1 %1060  ;;  %v1084_v46 = vperm.slane %v1028_v21, %v3117_v0 }
 0x31e   :  { %v1095_v45 = vperm.slane %v1061_v27, %v3117_v0 }
 0x320   :  { %v1123_v51 = vsel %vm731_vm6, %v1095_v45, %v1122_v43  ;;  %v1085_v45 = vperm.slane %v1031_v42, %v3117_v0 }
 0x321   :  { %v1124_v11 = vsel %vm733_vm7, %v1096_v9, %v1123_v51  ;;  %v1040_v9 = vpop.permute.xlu2 %1039 }
 0x322   :  { %v1138_v25 = vsel %vm760_vm8, %v1124_v11, 0.0  ;;  %v1088_v11 = vperm.slane %v1040_v9, %v3117_v0 }
 0x323   :  { %1139 = vadd.xlane.f32.xlu2 %v1138_v25 }
 0x324   :  { %v1037_v54 = vpop.permute.xlu0 %1036 }
 0x325   :  { %v1025_v23 = vpop.permute.xlu1 %1024  ;;  %v1087_v51 = vperm.slane %v1037_v54, %v3117_v0 }
 0x326   :  { %v1083_v22 = vperm.slane %v1025_v23, %v3117_v0 }
 0x328   :  { %v1112_v30 = vsel %vm723_vm2, %v1083_v22, %v1111_v58 }
 0x329   :  { %v1113_v27 = vsel %vm725_vm3, %v1084_v46, %v1112_v30 }
 0x32a   :  { %v1114_v56 = vsel %vm727_vm5, %v1085_v45, %v1113_v27 }
 0x32d   :  { %v1034_v43 = vpop.permute.xlu1 %1033 }
 0x32e   :  { %v1086_v37 = vperm.slane %v1034_v43, %v3117_v0 }
 0x330   :  { %v1115_v25 = vsel %vm729_vm4, %v1086_v37, %v1114_v56 }
 0x331   :  { %v1116_v20 = vsel %vm731_vm6, %v1087_v51, %v1115_v25 }
 0x332   :  { %v1117_v21 = vsel %vm733_vm7, %v1088_v11, %v1116_v20 }
 0x333   :  { %v1135_v23 = vsel %vm760_vm8, %v1117_v21, 0.0 }
 0x334   :  { %1136 = vadd.xlane.f32.xlu0 %v1135_v23 }
 0x365   :  { %v1134_v42 = vpop.xlane.xlu1 %1133 }
 0x366   :  { %2428 = vrcp.f32 %v1134_v42 }
 0x36c   :  { %v2429_v47 = vpop.eup %2428 }
 0x36d   :  { %v1146_v22 = vmul.f32 %v2429_v47, %v1134_v42 }
 0x36f   :  { %v1150_v58 = vsub.f32 2.0, %v1146_v22 }
 0x371   :  { %v1154_v30 = vmul.f32 %v2429_v47, %v1150_v58 }
 0x373   :  { %v1170_v46 = vperm.slane %v1154_v30, 1  ;;  %v1169_v54 = vperm.slane %v1154_v30, 0  ;;  %v1171_v27 = vperm.slane %v1154_v30, 2  ;;  %v1173_v43 = vperm.slane %v1154_v30, 4 }
 0x374   :  { %v1172_v37 = vperm.slane %v1154_v30, 3  ;;  %v1174_v51 = vperm.slane %v1154_v30, 5 }
 0x375   :  { %v1234_v0 = vmul.f32 %v3245_v14, %v1170_v46  ;;  %v1233_v45 = vmul.f32 %v3248_v12, %v1169_v54  ;;  %v1235_v9 = vmul.f32 %v3243_v26, %v1171_v27  ;;  %v1237_v56 = vmul.f32 %v3257_v57, %v1173_v43 }
 0x376   :  { %v1236_v11 = vmul.f32 %v3260_v49, %v1172_v37  ;;  %v1238_v20 = vmul.f32 %v3255_v5, %v1174_v51  ;;  %v1176_v14 = vperm.slane %v1154_v30, 7  ;;  %v1175_v12 = vperm.slane %v1154_v30, 6 }
 0x377   :  { %1304 = vperm.xlu1 %2298, %v1234_v0   ;;  %1299 = vperm.xlu2 %2297, %v1233_v45  }
 0x378   :  { %1309 = vperm.xlu0 %2299, %v1235_v9   ;;  %v1240_v21 = vmul.f32 %v3272_v18, %v1176_v14  ;;  %v1239_v23 = vmul.f32 %v3275_v16, %v1175_v12 }
 0x37e   :  { %v1131_v25 = vpop.xlane.xlu2 %1130 }
 0x37f   :  { %2430 = vrcp.f32 %v1131_v25  ;;  %1319 = vperm.xlu1 %2298, %v1237_v56   ;;  %1314 = vperm.xlu2 %2297, %v1236_v11  }
 0x380   :  { %1324 = vperm.xlu0 %2299, %v1238_v20  }
 0x385   :  { %v2431_v26 = vpop.eup %2430 }
 0x386   :  { %v1145_v42 = vmul.f32 %v2431_v26, %v1131_v25 }
 0x387   :  { %1334 = vperm.xlu1 %2298, %v1240_v21   ;;  %1329 = vperm.xlu2 %2297, %v1239_v23  }
 0x388   :  { %v1149_v57 = vsub.f32 2.0, %v1145_v42 }
 0x38a   :  { %v1153_v47 = vmul.f32 %v2431_v26, %v1149_v57 }
 0x38c   :  { %v1163_v49 = vperm.slane %v1153_v47, 2  ;;  %v1162_v22 = vperm.slane %v1153_v47, 1  ;;  %v1161_v58 = vperm.slane %v1153_v47, 0  ;;  %v1165_v18 = vperm.slane %v1153_v47, 4 }
 0x38d   :  { %v1166_v30 = vperm.slane %v1153_v47, 5  ;;  %v1164_v16 = vperm.slane %v1153_v47, 3 }
 0x38e   :  { %v1227_v5 = vmul.f32 %v3288_v40, %v1163_v49  ;;  %v1226_v46 = vmul.f32 %v3285_v50, %v1162_v22  ;;  %v1225_v54 = vmul.f32 %v3270_v28, %v1161_v58  ;;  %v1229_v0 = vmul.f32 %v3300_v52, %v1165_v18 }
 0x38f   :  { %v1230_v45 = vmul.f32 %v3320_v7, %v1166_v30  ;;  %v1228_v9 = vmul.f32 %v3303_v55, %v1164_v16  ;;  %v1168_v50 = vperm.slane %v1153_v47, 7  ;;  %v1167_v40 = vperm.slane %v1153_v47, 6 }
 0x390   :  { %1269 = vperm.xlu0 %2299, %v1227_v5   ;;  %1264 = vperm.xlu2 %2297, %v1226_v46  }
 0x391   :  { %1259 = vperm.xlu1 %2298, %v1225_v54   ;;  %v1232_v37 = vmul.f32 %v3283_v59, %v1168_v50  ;;  %v1231_v51 = vmul.f32 %v3317_v60, %v1167_v40  ;;  %v1703_v40 = vrot.slane %v2875_v19, 6 }
 0x396   :  { %v1140_v27 = vpop.xlane.xlu2 %1139 }
 0x397   :  { %2432 = vrcp.f32 %v1140_v27 }
 0x398   :  { %1279 = vperm.xlu0 %2299, %v1229_v0   ;;  %1284 = vperm.xlu2 %2297, %v1230_v45  }
 0x399   :  { %1274 = vperm.xlu1 %2298, %v1228_v9  }
 0x39d   :  { %v2433_v28 = vpop.eup %2432 }
 0x39e   :  { %v1148_v43 = vmul.f32 %v2433_v28, %v1140_v27 }
 0x3a0   :  { %v1152_v56 = vsub.f32 2.0, %v1148_v43  ;;  %1294 = vperm.xlu0 %2299, %v1232_v37  }
 0x3a1   :  { %1289 = vperm.xlu1 %2298, %v1231_v51  }
 0x3a2   :  { %v1156_v52 = vmul.f32 %v2433_v28, %v1152_v56  ;;  %v1697_v28 = vrot.slane %v2832_v33, 7 }
 0x3a4   :  { %v1187_v11 = vperm.slane %v1156_v52, 2  ;;  %v1186_v7 = vperm.slane %v1156_v52, 1  ;;  %v1185_v25 = vperm.slane %v1156_v52, 0  ;;  %v1190_v59 = vperm.slane %v1156_v52, 5 }
 0x3a5   :  { %v1189_v60 = vperm.slane %v1156_v52, 4  ;;  %v1188_v26 = vperm.slane %v1156_v52, 3  ;;  %v1191_v49 = vperm.slane %v1156_v52, 6 }
 0x3a6   :  { %v1251_v55 = vmul.f32 %v3335_v3, %v1187_v11  ;;  %v1250_v20 = vmul.f32 %v3297_v53, %v1186_v7  ;;  %v1249_v14 = vmul.f32 %v3332_v35, %v1185_v25  ;;  %v1254_v23 = vmul.f32 %v3350_v39, %v1190_v59 }
 0x3a7   :  { %v1137_v12 = vpop.xlane.xlu0 %1136  ;;  %v1253_v42 = vmul.f32 %v3314_v36, %v1189_v60  ;;  %v1252_v3 = vmul.f32 %v3347_v48, %v1188_v26  ;;  %v1192_v35 = vperm.slane %v1156_v52, 7  ;;  %v1255_v5 = vmul.f32 %v3361_v29, %v1191_v49 }
 0x3a8   :  { %2434 = vrcp.f32 %v1137_v12  ;;  %1389 = vperm.xlu2 %2297, %v1251_v55   ;;  %1384 = vperm.xlu0 %2299, %v1250_v20   ;;  %v1690_v7 = vrot.slane %v2815_v17, 7  ;;  %v1704_v25 = vrot.slane %v2875_v19, 7 }
 0x3a9   :  { %1379 = vperm.xlu1 %2298, %v1249_v14   ;;  %v1256_v58 = vmul.f32 %v3329_v1, %v1192_v35  ;;  %v2500_v35 = vld [vmem:[#allocation10] sm:$0x7] }
 0x3ae   :  { %v2435_v21 = vpop.eup %2434 }
 0x3af   :  { %v1147_v57 = vmul.f32 %v2435_v21, %v1137_v12 }
 0x3b0   :  { %1404 = vperm.xlu2 %2297, %v1254_v23   ;;  %1399 = vperm.xlu0 %2299, %v1253_v42  }
 0x3b1   :  { %v1151_v53 = vsub.f32 2.0, %v1147_v57  ;;  %1394 = vperm.xlu1 %2298, %v1252_v3  }
 0x3b3   :  { %v1155_v47 = vmul.f32 %v2435_v21, %v1151_v53 }
 0x3b5   :  { %v1178_v22 = vperm.slane %v1155_v47, 1  ;;  %v1177_v36 = vperm.slane %v1155_v47, 0  ;;  %v1179_v39 = vperm.slane %v1155_v47, 2  ;;  %v1181_v48 = vperm.slane %v1155_v47, 4 }
 0x3b6   :  { %v1180_v1 = vperm.slane %v1155_v47, 3  ;;  %v1182_v16 = vperm.slane %v1155_v47, 5  ;;  %v1184_v29 = vperm.slane %v1155_v47, 7  ;;  %v1183_v45 = vperm.slane %v1155_v47, 6 }
 0x3b7   :  { %v1242_v46 = vmul.f32 %v3364_v41, %v1178_v22  ;;  %v1241_v54 = vmul.f32 %v3344_v13, %v1177_v36  ;;  %v1243_v18 = vmul.f32 %v3372_v31, %v1179_v39  ;;  %v1245_v30 = vmul.f32 %v3375_v15, %v1181_v48 }
 0x3b8   :  { %1414 = vperm.xlu0 %2299, %v1256_v58   ;;  %v1244_v41 = vmul.f32 %v3358_v2, %v1180_v1  ;;  %v1246_v27 = vmul.f32 %v3379_v6, %v1182_v16  ;;  %v1248_v0 = vmul.f32 %v3381_v38, %v1184_v29  ;;  %v1689_v13 = vrot.slane %v2815_v17, 6 }
 0x3b9   :  { %1409 = vperm.xlu1 %2298, %v1255_v5   ;;  %1344 = vperm.xlu2 %2297, %v1242_v46   ;;  %v1702_v31 = vrot.slane %v2875_v19, 5  ;;  %v1696_v15 = vrot.slane %v2832_v33, 6  ;;  %v1247_v50 = vmul.f32 %v3370_v62, %v1183_v45  ;;  %v3502_v47 = vperm.slane %v2500_v35, 2 }
 0x3c0   :  { %1339 = vperm.xlu0 %2299, %v1241_v54  }
 0x3c1   :  { %1349 = vperm.xlu1 %2298, %v1243_v18   ;;  %1359 = vperm.xlu2 %2297, %v1245_v30  }
 0x3c8   :  { %1354 = vperm.xlu0 %2299, %v1244_v41  }
 0x3c9   :  { %1364 = vperm.xlu1 %2298, %v1246_v27   ;;  %1374 = vperm.xlu2 %2297, %v1248_v0  }
 0x3d0   :  { %1733 = vrot.lane.b32.xlu0 %v1689_v13, %s2660_s4 }
 0x3d1   :  { %1763 = vrot.lane.b32.xlu1 %v1702_v31, %s2660_s4  ;;  %1749 = vrot.lane.b32.xlu2 %v1696_v15, %s2660_s4  ;;  %v1300_v2 = vpop.permute.xlu2 %1299 }
 0x3d2   :  { %v1425_v6 = vmul.f32 %v1300_v2, %v2815_v17 }
 0x3d4   :  { %v1505_v38 = vsel %vm110_vm0, %v1425_v6, 0.0 }
 0x3d5   :  { %v1506_v9 = vrot.slane %v1505_v38, 4 }
 0x3d7   :  { %v1507_v43 = vadd.f32 %v1506_v9, %v1505_v38 }
 0x3d8   :  { %1369 = vperm.xlu0 %2299, %v1247_v50  }
 0x3d9   :  { %1765 = vrot.lane.b32.xlu1 %v1703_v40, %s2660_s4  ;;  %1751 = vrot.lane.b32.xlu2 %v1697_v28, %s2660_s4  ;;  %v1315_v37 = vpop.permute.xlu2 %1314  ;;  %v1508_v56 = vrot.slane %v1507_v43, 2 }
 0x3da   :  { %v1428_v51 = vmul.f32 %v1315_v37, %v2815_v17 }
 0x3db   :  { %v1509_v55 = vadd.f32 %v1508_v56, %v1507_v43 }
 0x3dc   :  { %v1526_v52 = vsel %vm110_vm0, %v1428_v51, 0.0 }
 0x3dd   :  { %v1527_v11 = vrot.slane %v1526_v52, 4  ;;  %v1510_v12 = vrot.slane %v1509_v55, 1 }
 0x3df   :  { %v1528_v62 = vadd.f32 %v1527_v11, %v1526_v52  ;;  %v1511_v60 = vadd.f32 %v1510_v12, %v1509_v55 }
 0x3e0   :  { %1735 = vrot.lane.b32.xlu0 %v1690_v7, %s2660_s4 }
 0x3e1   :  { %v1529_v20 = vrot.slane %v1528_v62, 2  ;;  %1767 = vrot.lane.b32.xlu1 %v1704_v25, %s2660_s4  ;;  %v1330_v14 = vpop.permute.xlu2 %1329  ;;  %v1809_v49 = vadd.f32 %v3026_v8, %v1511_v60 }
 0x3e2   :  { %v1431_v41 = vmul.f32 %v1330_v14, %v2815_v17 }
 0x3e3   :  { %v1530_v59 = vadd.f32 %v1529_v20, %v1528_v62  ;;  %v3509_v18 = vadd.f32 %v3502_v47, %v1809_v49 }
 0x3e4   :  { %v1547_v37 = vsel %vm110_vm0, %v1431_v41, 0.0 }
 0x3e5   :  { %v1531_v26 = vrot.slane %v1530_v59, 1  ;;  %v1914_v45 = vmul.f32 1.442695, %v3509_v18  ;;  %v1548_v12 = vrot.slane %v1547_v37, 4  ;;  %vm1874_vm9 = vcmp.gt.f32.partialorder %v3509_v18, 0.0 }
 0x3e7   :  { %v1532_v22 = vadd.f32 %v1531_v26, %v1530_v59  ;;  %2436 = vpow2.f32 %v1914_v45 }
 0x3e9   :  { %v1305_v21 = vpop.permute.xlu1 %1304  ;;  %v1812_v30 = vadd.f32 %v3059_v24, %v1532_v22 }
 0x3ea   :  { %v1426_v23 = vmul.f32 %v1305_v21, %v2815_v17  ;;  %v1310_v42 = vpop.permute.xlu0 %1309  ;;  %v1265_v57 = vpop.permute.xlu2 %1264 }
 0x3eb   :  { %v1427_v3 = vmul.f32 %v1310_v42, %v2815_v17  ;;  %v1418_v53 = vmul.f32 %v1265_v57, %v2792_v61  ;;  %v3517_v38 = vadd.f32 %v3502_v47, %v1812_v30 }
 0x3ec   :  { %v1512_v58 = vsel %vm110_vm0, %v1426_v23, 0.0 }
 0x3ed   :  { %v1513_v5 = vrot.slane %v1512_v58, 4  ;;  %v1519_v46 = vsel %vm110_vm0, %v1427_v3, 0.0  ;;  %v1456_v39 = vsel %vm110_vm0, %v1418_v53, 0.0  ;;  %v1920_v62 = vmul.f32 1.442695, %v3517_v38  ;;  %v2437_v3 = vpop.eup %2436 }
 0x3ee   :  { %v1520_v36 = vrot.slane %v1519_v46, 4  ;;  %v1457_v54 = vrot.slane %v1456_v39, 4  ;;  %v1549_v53 = vadd.f32 %v1548_v12, %v1547_v37  ;;  %vm1877_vm10 = vcmp.gt.f32.partialorder %v3517_v38, 0.0 }
 0x3ef   :  { %v1514_v48 = vadd.f32 %v1513_v5, %v1512_v58  ;;  %2438 = vpow2.f32 %v1920_v62 }
 0x3f0   :  { %v1521_v1 = vadd.f32 %v1520_v36, %v1519_v46  ;;  %v1458_v29 = vadd.f32 %v1457_v54, %v1456_v39  ;;  %v1550_v36 = vrot.slane %v1549_v53, 2 }
 0x3f1   :  { %v1515_v16 = vrot.slane %v1514_v48, 2  ;;  %v1320_v8 = vpop.permute.xlu1 %1319 }
 0x3f2   :  { %v1522_v27 = vrot.slane %v1521_v1, 2  ;;  %v1429_v0 = vmul.f32 %v1320_v8, %v2815_v17  ;;  %v1325_v13 = vpop.permute.xlu0 %1324  ;;  %v1285_v31 = vpop.permute.xlu2 %1284  ;;  %v1459_v2 = vrot.slane %v1458_v29, 2 }
 0x3f3   :  { %v1516_v15 = vadd.f32 %v1515_v16, %v1514_v48  ;;  %v1430_v6 = vmul.f32 %v1325_v13, %v2815_v17  ;;  %v1422_v9 = vmul.f32 %v1285_v31, %v2792_v61 }
 0x3f4   :  { %v1533_v24 = vsel %vm110_vm0, %v1429_v0, 0.0  ;;  %v1523_v40 = vadd.f32 %v1522_v27, %v1521_v1  ;;  %v1460_v52 = vadd.f32 %v1459_v2, %v1458_v29 }
 0x3f5   :  { %v1517_v50 = vrot.slane %v1516_v15, 1  ;;  %v1534_v28 = vrot.slane %v1533_v24, 4  ;;  %v1540_v43 = vsel %vm110_vm0, %v1430_v6, 0.0  ;;  %v1484_v7 = vsel %vm110_vm0, %v1422_v9, 0.0  ;;  %v2439_v46 = vpop.eup %2438 }
 0x3f6   :  { %v1541_v51 = vrot.slane %v1540_v43, 4  ;;  %v1524_v20 = vrot.slane %v1523_v40, 1  ;;  %v1485_v59 = vrot.slane %v1484_v7, 4  ;;  %v1461_v26 = vrot.slane %v1460_v52, 1 }
 0x3f7   :  { %v1518_v56 = vadd.f32 %v1517_v50, %v1516_v15  ;;  %v1535_v11 = vadd.f32 %v1534_v28, %v1533_v24  ;;  %v2254_v31 = vadd.f32 -1.0, %v2439_v46  ;;  %v3537_v6 = vadd.f32 %v1550_v36, %v1549_v53 }
 0x3f8   :  { %v1542_v25 = vadd.f32 %v1541_v51, %v1540_v43  ;;  %v1525_v57 = vadd.f32 %v1524_v20, %v1523_v40  ;;  %v1486_v35 = vadd.f32 %v1485_v59, %v1484_v7  ;;  %v1462_v49 = vadd.f32 %v1461_v26, %v1460_v52 }
 0x3f9   :  { %v1810_v55 = vadd.f32 %v3037_v63, %v1518_v56  ;;  %v1335_v14 = vpop.permute.xlu1 %1334  ;;  %v1536_v21 = vrot.slane %v1535_v11, 2  ;;  %v2251_v63 = vadd.f32 -1.0, %v2437_v3  ;;  %v2005_v51 = vmul.f32 1.6732632, %v2254_v31 }
 0x3fa   :  { %v1543_v23 = vrot.slane %v1542_v25, 2  ;;  %v1811_v5 = vadd.f32 %v3049_v32, %v1525_v57  ;;  %v1487_v39 = vrot.slane %v1486_v35, 2  ;;  %v1802_v30 = vadd.f32 %v2958_v44, %v1462_v49 }
 0x3fb   :  { %v1843_v60 = vadd.f32 %v3502_v47, %v1810_v55  ;;  %v1537_v22 = vadd.f32 %v1536_v21, %v1535_v11  ;;  %v2002_v13 = vmul.f32 1.6732632, %v2251_v63  ;;  %v1432_v12 = vmul.f32 %v1335_v14, %v2815_v17 }
 0x3fc   :  { %v1544_v58 = vadd.f32 %v1543_v23, %v1542_v25  ;;  %v3533_v32 = vadd.f32 %v3502_v47, %v1811_v5  ;;  %v1488_v2 = vadd.f32 %v1487_v39, %v1486_v35  ;;  %v3541_v45 = vadd.f32 %v3502_v47, %v1802_v30 }
 0x3fd   :  { %v1916_v42 = vmul.f32 1.442695, %v1843_v60  ;;  %v1538_v1 = vrot.slane %v1537_v22, 1  ;;  %v2034_v37 = vsel %vm1874_vm9, %v3509_v18, %v2002_v13  ;;  %vm1875_vm11 = vcmp.gt.f32.partialorder %v1843_v60, 0.0 }
 0x3fe   :  { %v1545_v8 = vrot.slane %v1544_v58, 1  ;;  %v1918_v56 = vmul.f32 1.442695, %v3533_v32  ;;  %v1489_v11 = vrot.slane %v1488_v2, 1  ;;  %v1900_v20 = vmul.f32 1.442695, %v3541_v45 }
 0x3ff   :  { %2440 = vpow2.f32 %v1916_v42  ;;  %v1539_v24 = vadd.f32 %v1538_v1, %v1537_v22  ;;  %v2066_v57 = vmul.f32 1.050701, %v2034_v37  ;;  %v2037_v17 = vsel %vm1877_vm10, %v3517_v38, %v2005_v51 }
 0x400   :  { %v1546_v40 = vadd.f32 %v1545_v8, %v1544_v58  ;;  %2442 = vpow2.f32 %v1918_v56  ;;  %v1490_v35 = vadd.f32 %v1489_v11, %v1488_v2  ;;  %v1554_v63 = vsel %vm110_vm0, %v1432_v12, 0.0 }
 0x401   :  { %v1813_v21 = vadd.f32 %v3041_v4, %v1539_v24  ;;  %2444 = vpow2.f32 %v1900_v20  ;;  %v1552_v30 = vrot.slane %v3537_v6, 1  ;;  %v1555_v1 = vrot.slane %v1554_v63, 4 }
 0x402   :  { %v1270_v48 = vpop.permute.xlu0 %1269  ;;  %v1390_v54 = vpop.permute.xlu2 %1389  ;;  %v1814_v18 = vadd.f32 %v3053_v10, %v1546_v40  ;;  %vm1876_vm12 = vcmp.gt.f32.partialorder %v3533_v32, 0.0  ;;  %vm1867_vm13 = vcmp.gt.f32.partialorder %v3541_v45, 0.0 }
 0x403   :  { %v1419_v16 = vmul.f32 %v1270_v48, %v2792_v61  ;;  %v1260_v29 = vpop.permute.xlu1 %1259  ;;  %v1443_v27 = vmul.f32 %v1390_v54, %v2875_v19  ;;  %v3560_v14 = vadd.f32 %v3502_v47, %v1813_v21  ;;  %v1806_v54 = vadd.f32 %v3008_v34, %v1490_v35 }
 0x404   :  { %v1417_v41 = vmul.f32 %v1260_v29, %v2792_v61  ;;  %v3563_v58 = vadd.f32 %v3502_v47, %v1814_v18  ;;  %v3579_v40 = vadd.f32 %v1555_v1, %v1554_v63 }
 0x405   :  { %v2441_v0 = vpop.eup %2440  ;;  %v1463_v15 = vsel %vm110_vm0, %v1419_v16, 0.0  ;;  %v1631_v43 = vsel %vm110_vm0, %v1443_v27, 0.0  ;;  %v1922_v13 = vmul.f32 1.442695, %v3560_v14  ;;  %v3577_v34 = vadd.f32 %v3502_v47, %v1806_v54 }
 0x406   :  { %v2252_v44 = vadd.f32 -1.0, %v2441_v0  ;;  %v1464_v9 = vrot.slane %v1463_v15, 4  ;;  %v1449_v28 = vsel %vm110_vm0, %v1417_v41, 0.0  ;;  %v1632_v59 = vrot.slane %v1631_v43, 4  ;;  %v2443_v27 = vpop.eup %2442 }
 0x407   :  { %v1450_v62 = vrot.slane %v1449_v28, 4  ;;  %v3572_v0 = vmul.f32 1.050701, %v2037_v17  ;;  %v2445_v31 = vpop.eup %2444  ;;  %2446 = vpow2.f32 %v1922_v13  ;;  %vm1878_vm14 = vcmp.gt.f32.partialorder %v3560_v14, 0.0 }
 0x408   :  { %v2003_v50 = vmul.f32 1.6732632, %v2252_v44  ;;  %v1465_v7 = vadd.f32 %v1464_v9, %v1463_v15  ;;  %v1924_v15 = vmul.f32 1.442695, %v3563_v58  ;;  %v2244_v37 = vadd.f32 -1.0, %v2445_v31 }
 0x409   :  { %v1451_v42 = vadd.f32 %v1450_v62, %v1449_v28  ;;  %vm1879_vm15 = vcmp.gt.f32.partialorder %v3563_v58, 0.0  ;;  %vm1871_vm8 = vcmp.gt.f32.partialorder %v3577_v34, 0.0 }
 0x40a   :  { %v2035_v52 = vsel %vm1875_vm11, %v1843_v60, %v2003_v50  ;;  %v1280_v25 = vpop.permute.xlu0 %1279  ;;  %v1466_v23 = vrot.slane %v1465_v7, 2  ;;  %v1633_v60 = vadd.f32 %v1632_v59, %v1631_v43  ;;  %v3568_v48 = vpop.permute.xlu2 %1404  ;;  %v2253_v50 = vadd.f32 -1.0, %v2443_v27  ;;  %v3959_v59 = vld [vmem:[#allocation18_spill] sm:$0xff] }
 0x40b   :  { %v2067_v55 = vmul.f32 1.050701, %v2035_v52  ;;  %v1275_v26 = vpop.permute.xlu1 %1274  ;;  %v1421_v53 = vmul.f32 %v1280_v25, %v2792_v61  ;;  %v1452_v49 = vrot.slane %v1451_v42, 2  ;;  %v3582_v43 = vadd.f32 %v1552_v30, %v3537_v6  ;;  %v3961_v30 = vld [vmem:[#allocation20_spill] sm:$0xff] }
 0x40c   :  { %v1420_v22 = vmul.f32 %v1275_v26, %v2792_v61  ;;  %v1467_v10 = vadd.f32 %v1466_v23, %v1465_v7  ;;  %v1634_v36 = vrot.slane %v1633_v60, 2  ;;  %v2140_v52 = vrot.slane %v3572_v0, 5 }
 0x40d   :  { %v2136_v3 = vrot.slane %v2067_v55, 7  ;;  %v1477_v5 = vsel %vm110_vm0, %v1421_v53, 0.0  ;;  %v1453_v46 = vadd.f32 %v1452_v49, %v1451_v42  ;;  %2448 = vpow2.f32 %v1924_v15  ;;  %v2447_v17 = vpop.eup %2446 }
 0x40e   :  { %v1478_v39 = vrot.slane %v1477_v5, 4  ;;  %v1470_v38 = vsel %vm110_vm0, %v1420_v22, 0.0  ;;  %v1468_v16 = vrot.slane %v1467_v10, 1  ;;  %v1635_v2 = vadd.f32 %v1634_v36, %v1633_v60 }
 0x40f   :  { %v3557_v4 = vsel %vm721_vm1, %v2136_v3, %v2066_v57  ;;  %v1471_v8 = vrot.slane %v1470_v38, 4  ;;  %v1454_v44 = vrot.slane %v1453_v46, 1  ;;  %v1908_v25 = vmul.f32 1.442695, %v3577_v34  ;;  %v3960_v3 = vld [vmem:[#allocation17_spill] sm:$0xff] }
 0x410   :  { %v1479_v29 = vadd.f32 %v1478_v39, %v1477_v5  ;;  %v1469_v28 = vadd.f32 %v1468_v16, %v1467_v10  ;;  %v1636_v7 = vrot.slane %v1635_v2, 1  ;;  %v2004_v6 = vmul.f32 1.6732632, %v2253_v50 }
 0x411   :  { %v1472_v9 = vadd.f32 %v1471_v8, %v1470_v38  ;;  %v1455_v11 = vadd.f32 %v1454_v44, %v1453_v46  ;;  %v1995_v18 = vmul.f32 1.6732632, %v2244_v37  ;;  %v1557_v23 = vrot.slane %v3579_v40, 2  ;;  %v3963_v44 = vld [vmem:[#allocation16_spill] sm:$0xff] }
 0x412   :  { %v1295_v41 = vpop.permute.xlu0 %1294  ;;  %v1480_v24 = vrot.slane %v1479_v29, 2  ;;  %v1803_v26 = vadd.f32 %v3959_v59, %v1469_v28  ;;  %v1637_v53 = vadd.f32 %v1636_v7, %v1635_v2  ;;  %2450 = vpow2.f32 %v1908_v25 }
 0x413   :  { %v1473_v56 = vrot.slane %v1472_v9, 2  ;;  %v1290_v62 = vpop.permute.xlu1 %1289  ;;  %v1424_v12 = vmul.f32 %v1295_v41, %v2792_v61  ;;  %v1345_v21 = vpop.permute.xlu2 %1344  ;;  %v1801_v60 = vadd.f32 %v3960_v3, %v1455_v11  ;;  %v2036_v36 = vsel %vm1876_vm12, %v3533_v32, %v2004_v6  ;;  %v3962_v41 = vld [vmem:[#allocation31_spill] sm:$0xff] }
 0x414   :  { %v1481_v51 = vadd.f32 %v1480_v24, %v1479_v29  ;;  %v1423_v49 = vmul.f32 %v1290_v62, %v2792_v61  ;;  %v1434_v5 = vmul.f32 %v1345_v21, %v2832_v33  ;;  %v2449_v46 = vpop.eup %2448  ;;  %v3599_v39 = vadd.f32 %v3502_v47, %v1803_v26 }
 0x415   :  { %v1474_v20 = vadd.f32 %v1473_v56, %v1472_v9  ;;  %v1498_v57 = vsel %vm110_vm0, %v1424_v12, 0.0  ;;  %v3607_v8 = vadd.f32 %v3502_v47, %v1801_v60  ;;  %v1827_v32 = vadd.f32 %v3962_v41, %v1637_v53 }
 0x416   :  { %v1482_v55 = vrot.slane %v1481_v51, 1  ;;  %v1499_v35 = vrot.slane %v1498_v57, 4  ;;  %v1491_v54 = vsel %vm110_vm0, %v1423_v49, 0.0  ;;  %v1568_v16 = vsel %vm110_vm0, %v1434_v5, 0.0  ;;  %v3964_v49 = vld [vmem:[#allocation19_spill] sm:$0xff] }
 0x417   :  { %v1475_v42 = vrot.slane %v1474_v20, 1  ;;  %v1492_v1 = vrot.slane %v1491_v54, 4  ;;  %v1569_v13 = vrot.slane %v1568_v16, 4  ;;  %v2255_v31 = vadd.f32 -1.0, %v2447_v17 }
 0x418   :  { %v1483_v10 = vadd.f32 %v1482_v55, %v1481_v51  ;;  %v1500_v38 = vadd.f32 %v1499_v35, %v1498_v57  ;;  %v2256_v15 = vadd.f32 -1.0, %v2449_v46  ;;  %v3611_v9 = vmul.f32 1.050701, %v2036_v36  ;;  %v2451_v51 = vpop.eup %2450 }
 0x419   :  { %v1476_v63 = vadd.f32 %v1475_v42, %v1474_v20  ;;  %v1493_v24 = vadd.f32 %v1492_v1, %v1491_v54  ;;  %v1570_v28 = vadd.f32 %v1569_v13, %v1568_v16  ;;  %v2027_v56 = vsel %vm1867_vm13, %v3541_v45, %v1995_v18  ;;  %v3965_v13 = vld [vmem:[#allocation22_spill] sm:$0xff] }
 0x41a   :  { %v1385_v22 = vpop.permute.xlu0 %1384  ;;  %v1501_v27 = vrot.slane %v1500_v38, 2  ;;  %v1805_v2 = vadd.f32 %v3963_v44, %v1483_v10  ;;  %v1902_v11 = vmul.f32 1.442695, %v3599_v39  ;;  %v1898_v25 = vmul.f32 1.442695, %v3607_v8 }
 0x41b   :  { %v1804_v61 = vadd.f32 %v3961_v30, %v1476_v63  ;;  %v1442_v29 = vmul.f32 %v1385_v22, %v2875_v19  ;;  %v1380_v37 = vpop.permute.xlu1 %1379  ;;  %v3624_v55 = vadd.f32 %v3502_v47, %v1827_v32  ;;  %v1494_v12 = vrot.slane %v1493_v24, 2 }
 0x41c   :  { %v1502_v50 = vadd.f32 %v1501_v27, %v1500_v38  ;;  %v2006_v6 = vmul.f32 1.6732632, %v2255_v31  ;;  %v2007_v59 = vmul.f32 1.6732632, %v2256_v15  ;;  %v3627_v26 = vadd.f32 %v3502_v47, %v1805_v2 }
 0x41d   :  { %v3619_v7 = vadd.f32 %v3502_v47, %v1804_v61  ;;  %v1624_v62 = vsel %vm110_vm0, %v1442_v29, 0.0  ;;  %v1571_v45 = vrot.slane %v1570_v28, 2  ;;  %v2248_v21 = vadd.f32 -1.0, %v2451_v51 }
 0x41e   :  { %v1503_v20 = vrot.slane %v1502_v50, 1  ;;  %v1495_v42 = vadd.f32 %v1494_v12, %v1493_v24  ;;  %v1625_v57 = vrot.slane %v1624_v62, 4  ;;  %2452 = vpow2.f32 %v1902_v11 }
 0x41f   :  { %v1904_v3 = vmul.f32 1.442695, %v3619_v7  ;;  %v1572_v60 = vadd.f32 %v1571_v45, %v1570_v28  ;;  %v1441_v53 = vmul.f32 %v1380_v37, %v2875_v19  ;;  %2454 = vpow2.f32 %v1898_v25  ;;  %v3966_v28 = vld [vmem:[#allocation23_spill] sm:$0xff] }
 0x420   :  { %v1504_v18 = vadd.f32 %v1503_v20, %v1502_v50  ;;  %v1950_v35 = vmul.f32 1.442695, %v3624_v55  ;;  %v1496_v17 = vrot.slane %v1495_v42, 1  ;;  %v2038_v10 = vsel %vm1878_vm14, %v3560_v14, %v2006_v6  ;;  %v1360_v14 = vpop.permute.xlu2 %1359 }
 0x421   :  { %v1906_v63 = vmul.f32 1.442695, %v3627_v26  ;;  %v1573_v5 = vrot.slane %v1572_v60, 1  ;;  %v1626_v46 = vadd.f32 %v1625_v57, %v1624_v62  ;;  %v2039_v38 = vsel %vm1879_vm15, %v3563_v58, %v2007_v59 }
 0x422   :  { %v1808_v22 = vadd.f32 %v3964_v49, %v1504_v18  ;;  %v1400_v36 = vpop.permute.xlu0 %1399  ;;  %v1497_v30 = vadd.f32 %v1496_v17, %v1495_v42  ;;  %v1617_v61 = vsel %vm110_vm0, %v1441_v53, 0.0  ;;  %v1999_v1 = vmul.f32 1.6732632, %v2248_v21 }
 0x423   :  { %2456 = vpow2.f32 %v1904_v3  ;;  %v1574_v16 = vadd.f32 %v1573_v5, %v1572_v60  ;;  %v1627_v29 = vrot.slane %v1626_v46, 2  ;;  %v3644_v41 = vmul.f32 1.050701, %v2027_v56  ;;  %v1395_v27 = vpop.permute.xlu1 %1394 }
 0x424   :  { %v3641_v54 = vadd.f32 %v3502_v47, %v1808_v22  ;;  %v3646_v32 = vmul.f32 1.050701, %v2038_v10  ;;  %2458 = vpow2.f32 %v1950_v35  ;;  %v2453_v58 = vpop.eup %2452  ;;  %v1807_v31 = vadd.f32 %v3965_v13, %v1497_v30 }
 0x425   :  { %2460 = vpow2.f32 %v1906_v63  ;;  %v1628_v15 = vadd.f32 %v1627_v29, %v1626_v46  ;;  %v1618_v44 = vrot.slane %v1617_v61, 4  ;;  %v2455_v2 = vpop.eup %2454  ;;  %v3650_v24 = vmul.f32 1.050701, %v2039_v38 }
 0x426   :  { %v1912_v50 = vmul.f32 1.442695, %v3641_v54  ;;  %v1818_v37 = vadd.f32 %v3966_v28, %v1574_v16  ;;  %v1437_v51 = vmul.f32 %v1360_v14, %v2832_v33  ;;  %v2138_v56 = vrot.slane %v3611_v9, 6 }
 0x427   :  { %v2031_v11 = vsel %vm1871_vm8, %v3577_v34, %v1999_v1  ;;  %v1446_v62 = vmul.f32 %v3568_v48, %v2875_v19  ;;  %v3660_v25 = vadd.f32 %v3502_v47, %v1807_v31  ;;  %v2245_v20 = vadd.f32 -1.0, %v2453_v58 }
 0x428   :  { %v1619_v12 = vadd.f32 %v1618_v44, %v1617_v61  ;;  %v1589_v6 = vsel %vm110_vm0, %v1437_v51, 0.0  ;;  %v1445_v59 = vmul.f32 %v1400_v36, %v2875_v19  ;;  %v2122_v21 = vrot.slane %v3644_v41, 7 }
 0x429   :  { %v2457_v45 = vpop.eup %2456  ;;  %v2142_v18 = vrot.slane %v3646_v32, 4  ;;  %v2243_v42 = vadd.f32 -1.0, %v2455_v2  ;;  %v1629_v57 = vrot.slane %v1628_v15, 1  ;;  %v2144_v3 = vrot.slane %v3650_v24, 3 }
 0x42a   :  { %v2459_v34 = vpop.eup %2458  ;;  %2462 = vpow2.f32 %v1912_v50  ;;  %v3668_v48 = vadd.f32 %v3502_v47, %v1818_v37  ;;  %v1620_v60 = vrot.slane %v1619_v12, 2  ;;  %v3670_v35 = vmul.f32 1.050701, %v2031_v11  ;;  %v3674_v10 = vpop.permute.xlu0 %1414 }
 0x42b   :  { %v2461_v53 = vpop.eup %2460  ;;  %v1910_v49 = vmul.f32 1.442695, %v3660_v25  ;;  %v1590_v22 = vrot.slane %v1589_v6, 4  ;;  %v1645_v17 = vsel %vm110_vm0, %v1445_v59, 0.0  ;;  %v1996_v63 = vmul.f32 1.6732632, %v2245_v20  ;;  %v3679_v13 = vpop.permute.xlu1 %1409 }
 0x42c   :  { %v2246_v5 = vadd.f32 -1.0, %v2457_v45  ;;  %v1652_v46 = vsel %vm110_vm0, %v1446_v62, 0.0  ;;  %v1646_v36 = vrot.slane %v1645_v17, 4  ;;  %v1994_v38 = vmul.f32 1.6732632, %v2243_v42  ;;  %v1375_v37 = vpop.permute.xlu2 %1374  ;;  %v3967_v62 = vld [vmem:[#allocation29_spill] sm:$0xff] }
 0x42d   :  { %v2269_v30 = vadd.f32 -1.0, %v2459_v34  ;;  %v1630_v61 = vadd.f32 %v1629_v57, %v1628_v15  ;;  %v1591_v1 = vadd.f32 %v1590_v22, %v1589_v6  ;;  %v2247_v16 = vadd.f32 -1.0, %v2461_v53 }
 0x42e   :  { %v1932_v29 = vmul.f32 1.442695, %v3668_v48  ;;  %v1621_v14 = vadd.f32 %v1620_v60, %v1619_v12  ;;  %v1444_v58 = vmul.f32 %v1395_v27, %v2875_v19  ;;  %v2130_v31 = vrot.slane %v3670_v35, 3 }
 0x42f   :  { %vm1868_vm9 = vcmp.gt.f32.partialorder %v3599_v39, 0.0  ;;  %vm1866_vm10 = vcmp.gt.f32.partialorder %v3607_v8, 0.0  ;;  %2464 = vpow2.f32 %v1910_v49  ;;  %v1997_v15 = vmul.f32 1.6732632, %v2246_v5 }
 0x430   :  { %v2463_v44 = vpop.eup %2462  ;;  %v2028_v2 = vsel %vm1868_vm9, %v3599_v39, %v1996_v63  ;;  %v1592_v50 = vrot.slane %v1591_v1, 2  ;;  %v1647_v28 = vadd.f32 %v1646_v36, %v1645_v17  ;;  %v2026_v51 = vsel %vm1866_vm10, %v3607_v8, %v1994_v38 }
 0x431   :  { %v2020_v11 = vmul.f32 1.6732632, %v2269_v30  ;;  %v1653_v27 = vrot.slane %v1652_v46, 4  ;;  %v1826_v20 = vadd.f32 %v3967_v62, %v1630_v61  ;;  %v1998_v12 = vmul.f32 1.6732632, %v2247_v16 }
 0x432   :  { %2466 = vpow2.f32 %v1932_v29  ;;  %v1622_v6 = vrot.slane %v1621_v14, 1  ;;  %v1638_v59 = vsel %vm110_vm0, %v1444_v58, 0.0  ;;  %v2060_v45 = vmul.f32 1.050701, %v2028_v2  ;;  %v1340_v17 = vpop.permute.xlu0 %1339 }
 0x433   :  { %vm1869_vm11 = vcmp.gt.f32.partialorder %v3619_v7, 0.0  ;;  %v2250_v42 = vadd.f32 -1.0, %v2463_v44  ;;  %v1440_v39 = vmul.f32 %v1375_v37, %v2832_v33  ;;  %v2058_v57 = vmul.f32 1.050701, %v2026_v51  ;;  %v3968_v37 = vld [vmem:[#allocation32_spill] sm:$0xff] }
 0x434   :  { %v2029_v34 = vsel %vm1869_vm11, %v3619_v7, %v1997_v15  ;;  %v1593_v60 = vadd.f32 %v1592_v50, %v1591_v1  ;;  %v1648_v8 = vrot.slane %v1647_v28, 2  ;;  %vm1892_vm12 = vcmp.gt.f32.partialorder %v3624_v55, 0.0  ;;  %v1350_v15 = vpop.permute.xlu1 %1349 }
 0x435   :  { %v2465_v53 = vpop.eup %2464  ;;  %vm1870_vm13 = vcmp.gt.f32.partialorder %v3627_v26, 0.0  ;;  %v3694_v49 = vadd.f32 %v3502_v47, %v1826_v20  ;;  %v1639_v22 = vrot.slane %v1638_v59, 4  ;;  %v2052_v63 = vsel %vm1892_vm12, %v3624_v55, %v2020_v11 }
 0x436   :  { %v2030_v5 = vsel %vm1870_vm13, %v3627_v26, %v1998_v12  ;;  %v3698_v36 = vadd.f32 %v1653_v27, %v1652_v46  ;;  %v1623_v38 = vadd.f32 %v1622_v6, %v1621_v14  ;;  %v2124_v7 = vrot.slane %v2060_v45, 6 }
 0x437   :  { %v2061_v30 = vmul.f32 1.050701, %v2029_v34  ;;  %v2001_v61 = vmul.f32 1.6732632, %v2250_v42  ;;  %v1610_v1 = vsel %vm110_vm0, %v1440_v39, 0.0  ;;  %v2123_v29 = vsel %vm721_vm1, %v2122_v21, %v2058_v57 }
 0x438   :  { %v2467_v16 = vpop.eup %2466  ;;  %v2249_v58 = vadd.f32 -1.0, %v2465_v53  ;;  %v1594_v44 = vrot.slane %v1593_v60, 1  ;;  %v1649_v2 = vadd.f32 %v1648_v8, %v1647_v28  ;;  %v3704_v55 = vmul.f32 1.050701, %v2052_v63  ;;  %v3969_v63 = vld [vmem:[#allocation28_spill] sm:$0xff] }
 0x439   :  { %v3706_v26 = vmul.f32 1.050701, %v2030_v5  ;;  %v1948_v46 = vmul.f32 1.442695, %v3694_v49  ;;  %v1640_v14 = vadd.f32 %v1639_v22, %v1638_v59  ;;  %v1655_v50 = vrot.slane %v3698_v36, 2 }
 0x43a   :  { %vm1873_vm14 = vcmp.gt.f32.partialorder %v3641_v54, 0.0  ;;  %v1825_v51 = vadd.f32 %v3968_v37, %v1623_v38  ;;  %v1611_v41 = vrot.slane %v1610_v1, 4  ;;  %v2125_v21 = vsel %vm723_vm2, %v2124_v7, %v2123_v29  ;;  %v1355_v53 = vpop.permute.xlu0 %1354 }
 0x43b   :  { %v2126_v11 = vrot.slane %v2061_v30, 5  ;;  %v2033_v28 = vsel %vm1873_vm14, %v3641_v54, %v2001_v61  ;;  %v2260_v27 = vadd.f32 -1.0, %v2467_v16  ;;  %v2000_v62 = vmul.f32 1.6732632, %v2249_v58 }
 0x43c   :  { %v1595_v20 = vadd.f32 %v1594_v44, %v1593_v60  ;;  %v1650_v12 = vrot.slane %v1649_v2, 1  ;;  %v1433_v6 = vmul.f32 %v1340_v17, %v2832_v33  ;;  %v2128_v45 = vrot.slane %v3706_v26, 4 }
 0x43d   :  { %2468 = vpow2.f32 %v1948_v46  ;;  %v1641_v42 = vrot.slane %v1640_v14, 2  ;;  %v3717_v39 = vmul.f32 1.050701, %v2033_v28  ;;  %vm1872_vm15 = vcmp.gt.f32.partialorder %v3660_v25, 0.0 }
 0x43e   :  { %v3721_v57 = vadd.f32 %v3502_v47, %v1825_v51  ;;  %v1612_v54 = vadd.f32 %v1611_v41, %v1610_v1  ;;  %v3724_v34 = vsel %vm725_vm3, %v2126_v11, %v2125_v21  ;;  %vm1883_vm8 = vcmp.gt.f32.partialorder %v3668_v48, 0.0  ;;  %v3970_v41 = vld [vmem:[#allocation27_spill] sm:$0xff] }
 0x43f   :  { %v1561_v60 = vsel %vm110_vm0, %v1433_v6, 0.0  ;;  %v1435_v8 = vmul.f32 %v1350_v15, %v2832_v33  ;;  %v2032_v22 = vsel %vm1872_vm15, %v3660_v25, %v2000_v62  ;;  %v2011_v17 = vmul.f32 1.6732632, %v2260_v27  ;;  %v1365_v15 = vpop.permute.xlu1 %1364  ;;  %v3748_v27 = vpop.permute.xlu2 %1749 }
 0x440   :  { %v1821_v5 = vadd.f32 %v3969_v63, %v1595_v20  ;;  %v1651_v38 = vadd.f32 %v1650_v12, %v1649_v2  ;;  %v1642_v7 = vadd.f32 %v1641_v42, %v1640_v14  ;;  %v1448_v30 = vmul.f32 %v3674_v10, %v2875_v19 }
 0x441   :  { %v1562_v61 = vrot.slane %v1561_v60, 4  ;;  %v1575_v1 = vsel %vm110_vm0, %v1435_v8, 0.0  ;;  %v2134_v16 = vrot.slane %v3717_v39, 1  ;;  %v1946_v29 = vmul.f32 1.442695, %v3721_v57 }
 0x442   :  { %v1613_v58 = vrot.slane %v1612_v54, 2  ;;  %v1576_v44 = vrot.slane %v1575_v1, 4  ;;  %v3736_v25 = vmul.f32 1.050701, %v2032_v22  ;;  %v1447_v2 = vmul.f32 %v3679_v13, %v2875_v19 }
 0x443   :  { %v2469_v46 = vpop.eup %2468  ;;  %v1563_v14 = vadd.f32 %v1562_v61, %v1561_v60  ;;  %v1436_v37 = vmul.f32 %v1355_v53, %v2832_v33  ;;  %v2043_v10 = vsel %vm1883_vm8, %v3668_v48, %v2011_v17  ;;  %v3745_v51 = vadd.f32 %v3502_v47, %v1821_v5 }
 0x444   :  { %v1829_v21 = vadd.f32 %v3970_v41, %v1651_v38  ;;  %v1577_v11 = vadd.f32 %v1576_v44, %v1575_v1  ;;  %v1643_v28 = vrot.slane %v1642_v7, 1  ;;  %v1438_v19 = vmul.f32 %v1365_v15, %v2832_v33  ;;  %v1734_v1 = vpop.permute.xlu0 %1733 }
 0x445   :  { %v1564_v62 = vrot.slane %v1563_v14, 2  ;;  %v1582_v20 = vsel %vm110_vm0, %v1436_v37, 0.0  ;;  %v2268_v13 = vadd.f32 -1.0, %v2469_v46  ;;  %2470 = vpow2.f32 %v1946_v29 }
 0x446   :  { %v1578_v12 = vrot.slane %v1577_v11, 2  ;;  %v1614_v6 = vadd.f32 %v1613_v58, %v1612_v54  ;;  %vm1891_vm9 = vcmp.gt.f32.partialorder %v3694_v49, 0.0  ;;  %v1659_v48 = vsel %vm110_vm0, %v1447_v2, 0.0 }
 0x447   :  { %v1565_v42 = vadd.f32 %v1564_v62, %v1563_v14  ;;  %v1583_v60 = vrot.slane %v1582_v20, 4  ;;  %v1596_v8 = vsel %vm110_vm0, %v1438_v19, 0.0  ;;  %v1938_v53 = vmul.f32 1.442695, %v3745_v51 }
 0x448   :  { %v3757_v22 = vsel %vm110_vm0, %v1448_v30, 0.0  ;;  %v1579_v17 = vadd.f32 %v1578_v12, %v1577_v11  ;;  %v1597_v63 = vrot.slane %v1596_v8, 4  ;;  %v3760_v5 = vadd.f32 %v3502_v47, %v1829_v21 }
 0x449   :  { %v1644_v38 = vadd.f32 %v1643_v28, %v1642_v7  ;;  %v1566_v54 = vrot.slane %v1565_v42, 1  ;;  %v1584_v61 = vadd.f32 %v1583_v60, %v1582_v20  ;;  %v1660_v29 = vrot.slane %v1659_v48, 4  ;;  %v3971_v28 = vld [vmem:[#allocation25_spill] sm:$0xff] }
 0x44a   :  { %v1580_v58 = vrot.slane %v1579_v17, 1  ;;  %v1615_v44 = vrot.slane %v1614_v6, 1  ;;  %v1598_v15 = vadd.f32 %v1597_v63, %v1596_v8  ;;  %v2132_v46 = vrot.slane %v3736_v25, 2  ;;  %v3972_v20 = vld [vmem:[#allocation21_spill] sm:$0xff]  ;;  %v3973_v8 = vld [vmem:[#allocation24_spill] sm:$0xff] }
 0x44b   :  { %v3763_v2 = vmul.f32 1.050701, %v2043_v10  ;;  %v2019_v14 = vmul.f32 1.6732632, %v2268_v13  ;;  %v1567_v30 = vadd.f32 %v1566_v54, %v1565_v42  ;;  %v2471_v37 = vpop.eup %2470  ;;  %2472 = vpow2.f32 %v1938_v53  ;;  %v1752_v42 = vpop.permute.xlu2 %1751 }
 0x44c   :  { %v1667_v41 = vrot.slane %v3757_v22, 4  ;;  %v1581_v21 = vadd.f32 %v1580_v58, %v1579_v17  ;;  %v1585_v11 = vrot.slane %v1584_v61, 2  ;;  %v1954_v7 = vmul.f32 1.442695, %v3760_v5 }
 0x44d   :  { %v1828_v62 = vadd.f32 %v3971_v28, %v1644_v38  ;;  %v1817_v19 = vadd.f32 %v3972_v20, %v1567_v30  ;;  %v1599_v12 = vrot.slane %v1598_v15, 2  ;;  %v1661_v60 = vadd.f32 %v1660_v29, %v1659_v48  ;;  %v3974_v28 = vld [vmem:[#allocation26_spill] sm:$0xff] }
 0x44e   :  { %v1819_v63 = vadd.f32 %v3973_v8, %v1581_v21  ;;  %v1616_v10 = vadd.f32 %v1615_v44, %v1614_v6  ;;  %v1586_v59 = vadd.f32 %v1585_v11, %v1584_v61  ;;  %v1815_v17 = vadd.f32 %v1734_v1, %v3582_v43  ;;  %v1764_v44 = vpop.permute.xlu1 %1763  ;;  %v1370_v21 = vpop.permute.xlu0 %1369 }
 0x44f   :  { %v3771_v13 = vadd.f32 %v3502_v47, %v1817_v19  ;;  %v1600_v53 = vadd.f32 %v1599_v12, %v1598_v15  ;;  %v2139_v38 = vsel %vm723_vm2, %v2138_v56, %v3557_v4  ;;  %v2051_v48 = vsel %vm1891_vm9, %v3694_v49, %v2019_v14  ;;  %v3975_v19 = vld [vmem:[#allocation30_spill] sm:$0xff] }
 0x450   :  { %v2267_v54 = vadd.f32 -1.0, %v2471_v37  ;;  %v3782_v6 = vadd.f32 %v3502_v47, %v1819_v63  ;;  %v1587_v61 = vrot.slane %v1586_v59, 1  ;;  %vm1890_vm10 = vcmp.gt.f32.partialorder %v3721_v57, 0.0 }
 0x451   :  { %2474 = vpow2.f32 %v1954_v7  ;;  %v3786_v29 = vadd.f32 %v3502_v47, %v1828_v62  ;;  %v1930_v43 = vmul.f32 1.442695, %v3771_v13  ;;  %v1601_v9 = vrot.slane %v1600_v53, 1  ;;  %v2473_v1 = vpop.eup %2472 }
 0x452   :  { %v1662_v4 = vrot.slane %v1661_v60, 2  ;;  %v1934_v56 = vmul.f32 1.442695, %v3782_v6  ;;  %v1824_v58 = vadd.f32 %v1752_v42, %v1616_v10  ;;  %v1588_v49 = vadd.f32 %v1587_v61, %v1586_v59 }
 0x453   :  { %v1602_v15 = vadd.f32 %v1601_v9, %v1600_v53  ;;  %v3791_v14 = vadd.f32 %v3502_v47, %v1815_v17  ;;  %v2141_v30 = vsel %vm725_vm3, %v2140_v52, %v2139_v38  ;;  %v1656_v37 = vadd.f32 %v1655_v50, %v3698_v36 }
 0x454   :  { %v2083_v11 = vmul.f32 1.050701, %v2051_v48  ;;  %v2018_v7 = vmul.f32 1.6732632, %v2267_v54  ;;  %v1820_v62 = vadd.f32 %v3974_v28, %v1588_v49  ;;  %v2143_v59 = vsel %vm727_vm5, %v2142_v18, %v2141_v30 }
 0x455   :  { %v2263_v20 = vadd.f32 -1.0, %v2473_v1  ;;  %2476 = vpow2.f32 %v1930_v43  ;;  %v1822_v12 = vadd.f32 %v3975_v19, %v1602_v15  ;;  %v3807_v0 = vsel %vm729_vm4, %v2144_v3, %v2143_v59 }
 0x456   :  { %2478 = vpow2.f32 %v1934_v56  ;;  %v3810_v52 = vadd.f32 %v3502_v47, %v1820_v62  ;;  %v1657_v36 = vrot.slane %v1656_v37, 1  ;;  %v1439_v50 = vmul.f32 %v1370_v21, %v2832_v33 }
 0x457   :  { %v2475_v8 = vpop.eup %2474  ;;  %v1952_v32 = vmul.f32 1.442695, %v3786_v29  ;;  %v3815_v18 = vadd.f32 %v3502_v47, %v1824_v58  ;;  %v1926_v63 = vmul.f32 1.442695, %v3791_v14  ;;  %v1663_v10 = vadd.f32 %v1662_v4, %v1661_v60 }
 0x458   :  { %v1936_v24 = vmul.f32 1.442695, %v3810_v52  ;;  %v3820_v3 = vadd.f32 %v3502_v47, %v1822_v12  ;;  %v1658_v42 = vadd.f32 %v1657_v36, %v1656_v37  ;;  %v1603_v53 = vsel %vm110_vm0, %v1439_v50, 0.0 }
 0x459   :  { %v2164_v17 = vrot.slane %v2083_v11, 7  ;;  %vm1886_vm11 = vcmp.gt.f32.partialorder %v3745_v51, 0.0  ;;  %v1668_v33 = vadd.f32 %v1667_v41, %v3757_v22  ;;  %v1604_v38 = vrot.slane %v1603_v53, 4  ;;  %v1766_v41 = vpop.permute.xlu1 %1765 }
 0x45a   :  { %v2050_v48 = vsel %vm1890_vm10, %v3721_v57, %v2018_v7  ;;  %v2014_v54 = vmul.f32 1.6732632, %v2263_v20  ;;  %2480 = vpow2.f32 %v1936_v24  ;;  %v1830_v60 = vadd.f32 %v1764_v44, %v1658_v42 }
 0x45b   :  { %v2477_v61 = vpop.eup %2476  ;;  %2482 = vpow2.f32 %v1952_v32  ;;  %v1944_v43 = vmul.f32 1.442695, %v3815_v18  ;;  %v1605_v9 = vadd.f32 %v1604_v38, %v1603_v53  ;;  %v1664_v1 = vrot.slane %v1663_v10, 1 }
 0x45c   :  { %v2479_v4 = vpop.eup %2478  ;;  %v2271_v56 = vadd.f32 -1.0, %v2475_v8  ;;  %v1940_v58 = vmul.f32 1.442695, %v3820_v3  ;;  %2484 = vpow2.f32 %v1926_v63  ;;  %v3831_v22 = vadd.f32 %v3502_v47, %v1830_v60 }
 0x45d   :  { %v1669_v49 = vrot.slane %v1668_v33, 2  ;;  %v1606_v57 = vrot.slane %v1605_v9, 2  ;;  %v1665_v15 = vadd.f32 %v1664_v1, %v1663_v10  ;;  %v1558_v44 = vadd.f32 %v1557_v23, %v3579_v40  ;;  %v1736_v10 = vpop.permute.xlu0 %1735 }
 0x45e   :  { %v2082_v30 = vmul.f32 1.050701, %v2050_v48  ;;  %v2046_v37 = vsel %vm1886_vm11, %v3745_v51, %v2014_v54  ;;  %v2259_v21 = vadd.f32 -1.0, %v2477_v61  ;;  %v1956_v11 = vmul.f32 1.442695, %v3831_v22 }
 0x45f   :  { %v2261_v7 = vadd.f32 -1.0, %v2479_v4  ;;  %2486 = vpow2.f32 %v1944_v43  ;;  %v1607_v28 = vadd.f32 %v1606_v57, %v1605_v9  ;;  %v1831_v62 = vadd.f32 %v1766_v41, %v1665_v15 }
 0x460   :  { %v2481_v59 = vpop.eup %2480  ;;  %v2150_v20 = vrot.slane %v3763_v2, 7  ;;  %v2022_v19 = vmul.f32 1.6732632, %v2271_v56  ;;  %2488 = vpow2.f32 %v1940_v58  ;;  %v1559_v12 = vrot.slane %v1558_v44, 1 }
 0x461   :  { %v2483_v36 = vpop.eup %2482  ;;  %v3842_v40 = vsel %vm721_vm1, %v2164_v17, %v2082_v30  ;;  %vm1894_vm12 = vcmp.gt.f32.partialorder %v3760_v5, 0.0  ;;  %v2262_v23 = vadd.f32 -1.0, %v2481_v59  ;;  %v1608_v51 = vrot.slane %v1607_v28, 1 }
 0x462   :  { %v2485_v50 = vpop.eup %2484  ;;  %v3845_v8 = vmul.f32 1.050701, %v2046_v37  ;;  %v2010_v32 = vmul.f32 1.6732632, %v2259_v21  ;;  %2490 = vpow2.f32 %v1956_v11  ;;  %v3848_v63 = vadd.f32 %v3502_v47, %v1831_v62 }
 0x463   :  { %vm1893_vm13 = vcmp.gt.f32.partialorder %v3786_v29, 0.0  ;;  %v2012_v24 = vmul.f32 1.6732632, %v2261_v7  ;;  %v1609_v42 = vadd.f32 %v1608_v51, %v1607_v28  ;;  %v1560_v53 = vadd.f32 %v1559_v12, %v1558_v44 }
 0x464   :  { %v1670_v17 = vadd.f32 %v1669_v49, %v1668_v33  ;;  %v2054_v38 = vsel %vm1894_vm12, %v3760_v5, %v2022_v19  ;;  %v2270_v48 = vadd.f32 -1.0, %v2483_v36  ;;  %v2013_v54 = vmul.f32 1.6732632, %v2262_v23  ;;  %v1768_v49 = vpop.permute.xlu1 %1767 }
 0x465   :  { %v1958_v60 = vmul.f32 1.442695, %v3848_v63  ;;  %v2487_v61 = vpop.eup %2486  ;;  %vm1882_vm14 = vcmp.gt.f32.partialorder %v3771_v13, 0.0  ;;  %v2257_v43 = vadd.f32 -1.0, %v2485_v50  ;;  %v1823_v9 = vadd.f32 %v3748_v27, %v1609_v42 }
 0x466   :  { %v1816_v1 = vadd.f32 %v1736_v10, %v1560_v53  ;;  %v2489_v4 = vpop.eup %2488  ;;  %vm1884_vm15 = vcmp.gt.f32.partialorder %v3782_v6, 0.0  ;;  %vm1885_vm8 = vcmp.gt.f32.partialorder %v3810_v52, 0.0  ;;  %v1671_v33 = vrot.slane %v1670_v17, 1 }
 0x467   :  { %2492 = vpow2.f32 %v1958_v60  ;;  %v2042_v5 = vsel %vm1882_vm14, %v3771_v13, %v2010_v32  ;;  %v2044_v56 = vsel %vm1884_vm15, %v3782_v6, %v2012_v24  ;;  %v3860_v58 = vadd.f32 %v3502_v47, %v1823_v9 }
 0x468   :  { %v3863_v41 = vadd.f32 %v3502_v47, %v1816_v1  ;;  %v2491_v27 = vpop.eup %2490  ;;  %v2021_v57 = vmul.f32 1.6732632, %v2270_v48  ;;  %v2045_v15 = vsel %vm1885_vm8, %v3810_v52, %v2013_v54  ;;  %v1672_v44 = vadd.f32 %v1671_v33, %v1670_v17 }
 0x469   :  { %v2129_v30 = vsel %vm727_vm5, %v2128_v45, %v3724_v34  ;;  %v2266_v13 = vadd.f32 -1.0, %v2487_v61  ;;  %v2264_v37 = vadd.f32 -1.0, %v2489_v4  ;;  %v2008_v6 = vmul.f32 1.6732632, %v2257_v43 }
 0x46a   :  { %v1942_v21 = vmul.f32 1.442695, %v3860_v58  ;;  %v2074_v11 = vmul.f32 1.050701, %v2042_v5  ;;  %v2076_v7 = vmul.f32 1.050701, %v2044_v56  ;;  %v1832_v62 = vadd.f32 %v1768_v49, %v1672_v44 }
 0x46b   :  { %v1928_v28 = vmul.f32 1.442695, %v3863_v41  ;;  %v2077_v59 = vmul.f32 1.050701, %v2045_v15  ;;  %v2272_v19 = vadd.f32 -1.0, %v2491_v27  ;;  %v2131_v52 = vsel %vm729_vm4, %v2130_v31, %v2129_v30 }
 0x46c   :  { %2494 = vpow2.f32 %v1942_v21  ;;  %v2053_v45 = vsel %vm1893_vm13, %v3786_v29, %v2021_v57  ;;  %v3879_v34 = vadd.f32 %v3502_v47, %v1832_v62  ;;  %v2133_v12 = vsel %vm731_vm6, %v2132_v46, %v2131_v52 }
 0x46d   :  { %v2493_v26 = vpop.eup %2492  ;;  %2496 = vpow2.f32 %v1928_v28  ;;  %v2015_v36 = vmul.f32 1.6732632, %v2264_v37  ;;  %vm1880_vm9 = vcmp.gt.f32.partialorder %v3791_v14, 0.0  ;;  %v2135_v35 = vsel %vm733_vm7, %v2134_v16, %v2133_v12 }
 0x46e   :  { %v2273_v23 = vadd.f32 -1.0, %v2493_v26  ;;  %v2152_v31 = vrot.slane %v2076_v7, 6  ;;  %v2017_v51 = vmul.f32 1.6732632, %v2266_v13  ;;  %v2040_v29 = vsel %vm1880_vm9, %v3791_v14, %v2008_v6  ;;  %2182 = vst.msk [vmem:[#allocation11] sm:$0xff] %vm110_vm0, %v2135_v35 }
 0x46f   :  { %v1960_v50 = vmul.f32 1.442695, %v3879_v34  ;;  %v2156_v47 = vrot.slane %v3845_v8, 4  ;;  %v2151_v25 = vsel %vm721_vm1, %v2150_v20, %v2074_v11  ;;  %v2154_v46 = vrot.slane %v2077_v59, 5 }
 0x470   :  { %v2023_v32 = vmul.f32 1.6732632, %v2272_v19  ;;  %v2085_v10 = vmul.f32 1.050701, %v2053_v45  ;;  %vm1887_vm10 = vcmp.gt.f32.partialorder %v3820_v3, 0.0  ;;  %vm1889_vm11 = vcmp.gt.f32.partialorder %v3815_v18, 0.0 }
 0x471   :  { %v2024_v39 = vmul.f32 1.6732632, %v2273_v23  ;;  %2498 = vpow2.f32 %v1960_v50  ;;  %v2086_v24 = vmul.f32 1.050701, %v2054_v38  ;;  %v2047_v14 = vsel %vm1887_vm10, %v3820_v3, %v2015_v36 }
 0x472   :  { %v2495_v16 = vpop.eup %2494  ;;  %v2072_v42 = vmul.f32 1.050701, %v2040_v29  ;;  %v2153_v8 = vsel %vm723_vm2, %v2152_v31, %v2151_v25  ;;  %v2049_v2 = vsel %vm1889_vm11, %v3815_v18, %v2017_v51  ;;  %vm1895_vm1 = vcmp.gt.f32.partialorder %v3831_v22, 0.0 }
 0x473   :  { %v2497_v53 = vpop.eup %2496  ;;  %v2265_v20 = vadd.f32 -1.0, %v2495_v16  ;;  %v2155_v17 = vsel %vm725_vm3, %v2154_v46, %v2153_v8  ;;  %v2055_v48 = vsel %vm1895_vm1, %v3831_v22, %v2023_v32  ;;  %vm1896_vm12 = vcmp.gt.f32.partialorder %v3848_v63, 0.0 }
 0x474   :  { %v2258_v38 = vadd.f32 -1.0, %v2497_v53  ;;  %v2168_v54 = vrot.slane %v2085_v10, 5  ;;  %v2079_v60 = vmul.f32 1.050701, %v2047_v14  ;;  %v2056_v3 = vsel %vm1896_vm12, %v3848_v63, %v2024_v39 }
 0x475   :  { %v2016_v61 = vmul.f32 1.6732632, %v2265_v20  ;;  %v2081_v43 = vmul.f32 1.050701, %v2049_v2  ;;  %v2146_v9 = vrot.slane %v2072_v42, 2  ;;  %vm1888_vm13 = vcmp.gt.f32.partialorder %v3860_v58, 0.0 }
 0x476   :  { %v2009_v18 = vmul.f32 1.6732632, %v2258_v38  ;;  %v2087_v4 = vmul.f32 1.050701, %v2055_v48  ;;  %vm1881_vm14 = vcmp.gt.f32.partialorder %v3863_v41, 0.0  ;;  %v2157_v22 = vsel %vm727_vm5, %v2156_v47, %v2155_v17 }
 0x477   :  { %v2499_v1 = vpop.eup %2498  ;;  %v2048_v33 = vsel %vm1888_vm13, %v3860_v58, %v2016_v61  ;;  %v2088_v56 = vmul.f32 1.050701, %v2056_v3  ;;  %v2170_v57 = vrot.slane %v2086_v24, 4  ;;  %v2158_v63 = vrot.slane %v2079_v60, 3 }
 0x478   :  { %v2080_v5 = vmul.f32 1.050701, %v2048_v33  ;;  %v2041_v49 = vsel %vm1881_vm14, %v3863_v41, %v2009_v18  ;;  %v2274_v27 = vadd.f32 -1.0, %v2499_v1  ;;  %v3976_v15 = vrot.slane %v3704_v55, 6 }
 0x479   :  { %v2073_v30 = vmul.f32 1.050701, %v2041_v49  ;;  %v2162_v13 = vrot.slane %v2081_v43, 1  ;;  %v2172_v21 = vrot.slane %v2087_v4, 3  ;;  %vm1897_vm15 = vcmp.gt.f32.partialorder %v3879_v34, 0.0 }
 0x47a   :  { %v2167_v44 = vsel %vm723_vm2, %v3976_v15, %v3842_v40  ;;  %v2160_v37 = vrot.slane %v2080_v5, 2  ;;  %v2025_v6 = vmul.f32 1.6732632, %v2274_v27  ;;  %v2159_v41 = vsel %vm729_vm4, %v2158_v63, %v2157_v22 }
 0x47b   :  { %v2169_v58 = vsel %vm725_vm3, %v2168_v54, %v2167_v44  ;;  %v2148_v11 = vrot.slane %v2073_v30, 1  ;;  %v2147_v7 = vsel %vm731_vm6, %v2146_v9, %v3807_v0  ;;  %v2174_v28 = vrot.slane %v2088_v56, 2 }
 0x47c   :  { %v2057_v55 = vsel %vm1897_vm15, %v3879_v34, %v2025_v6  ;;  %v2161_v40 = vsel %vm731_vm6, %v2160_v37, %v2159_v41  ;;  %v2171_v52 = vsel %vm727_vm5, %v2170_v57, %v2169_v58 }
 0x47d   :  { %v2149_v62 = vsel %vm733_vm7, %v2148_v11, %v2147_v7  ;;  %v2089_v59 = vmul.f32 1.050701, %v2057_v55  ;;  %v2163_v19 = vsel %vm733_vm7, %v2162_v13, %v2161_v40  ;;  %v2173_v0 = vsel %vm729_vm4, %v2172_v21, %v2171_v52 }
 0x47e   :  { %2183 = vst.msk [vmem:[#allocation11 + $0x8] sm:$0xff] %vm110_vm0, %v2149_v62  ;;  %v2175_v45 = vsel %vm731_vm6, %v2174_v28, %v2173_v0 }
 0x47f   :  { %v2176_v26 = vrot.slane %v2089_v59, 1  ;;  %2184 = vst.msk [vmem:[#allocation11 + $0x10] sm:$0xff] %vm110_vm0, %v2163_v19 }
 0x481   :  { %v2177_v34 = vsel %vm733_vm7, %v2176_v26, %v2175_v45 }
 0x482   :  { %2185 = vst.msk [vmem:[#allocation11 + $0x18] sm:$0xff] %vm110_vm0, %v2177_v34 }
 0x483   :  { %2198 = dma.vmem_to_hbm [thread:$0]  %s2191_s17, 512, %s2193_s20, [#allocation4], %s2654_s26, %s2654_s26, %s2655_s27  }
 0x484   :  { %2651 = dma.done.wait [#allocation4], 512  }
 0x485   :  { %2652 = vsyncadd [#allocation4], 4294966784 }
 0x486   :  { %2203 = vsyncpa [#allocation3], 1 }
 0x487   :  { %2204 = vsyncpa [#allocation6], 1 }
 0x488   :  { %2205 = vsyncpa [#allocation9], 1 }
 0x489   :  { %2206 = vsyncpa [#allocation4], 1 }

</bundles_post_ra>
